<compile_context>
chip_gen: v6e
topology: v6e:2x2x1
jax: 0.10.0
libtpu: 0.0.40
codegen_flags: <defaults>
</compile_context>

<pallas_src>
import math

import numpy as np
import jax
import jax.numpy as jnp
from jax import lax
from jax.experimental import pallas as pl
from jax.experimental.pallas import tpu as pltpu

BN_EPS = 1e-5


def _make_kernel(num_layers, teacher_forcing, H, Hp, mxu_dtype):
    L = num_layers - 1
    f32 = jnp.float32
    fuse_gate = Hp > H   # padded lanes available to carry the gate column

    def kernel(h_ref, x_ref, u_ref, mlo_ref, mhi_ref, sel_ref,
               w_ref, gamma_ref, beta_ref,
               wout_ref, bout_ref, wlin_ref, blin_ref,
               pred_ref, hnew_ref):
        BS = h_ref.shape[0]
        h = h_ref[...]                                         # (BS, Hp) f32

        # ---- conv_block: dilated Conv1d(k=3,'same') -> BatchNorm1d(train) -> ReLU
        # Three accumulated (BS,Hp)@(Hp,Hp) matmuls per layer; tap shifts via
        # XLU rolls + masks.  Conv bias omitted (cancelled by training BN).
        for i in range(L):
            d = 2 ** i
            mlo = mlo_ref[i]                                   # (BS,1): 0 where local_s <  d
            mhi = mhi_ref[i]                                   # (BS,1): 0 where local_s >= S-d
            hb = h.astype(mxu_dtype)                           # one cast, reused by 3 dots
            z0 = jnp.dot(hb, w_ref[3 * i + 0], preferred_element_type=f32)
            z1 = jnp.dot(hb, w_ref[3 * i + 1], preferred_element_type=f32)
            z2 = jnp.dot(hb, w_ref[3 * i + 2], preferred_element_type=f32)
            y = (pltpu.roll(z0, d, axis=0) * mlo               # tap0: h[s-d]
                 + z1                                          # tap1: h[s]
                 + pltpu.roll(z2, BS - d, axis=0) * mhi)       # tap2: h[s+d]
            # BatchNorm1d training-mode stats over (batch, length), biased var,
            # folded into one per-channel scale/shift (running stats host-side).
            mean = jnp.mean(y, axis=0, keepdims=True)                       # (1,Hp)
            var = jnp.maximum(jnp.mean(y * y, axis=0, keepdims=True)
                              - mean * mean, 0.0)
            scale = lax.rsqrt(var + BN_EPS) * gamma_ref[i:i + 1, :]
            shift = beta_ref[i:i + 1, :] - mean * scale
            h = jnp.maximum(y * scale + shift, 0.0)

        # ---- conv_out (H -> 1, k=3, pad=1): one (BS,Hp)@(Hp,3) matmul, then
        # roll/mask the three result columns.
        y3 = jnp.dot(h.astype(mxu_dtype), wout_ref[...],
                     preferred_element_type=f32)               # (BS, 3)
        xp = (pltpu.roll(y3, 1, axis=0)[:, 0:1] * mlo_ref[0]
              + y3[:, 1:2]
              + pltpu.roll(y3, BS - 1, axis=0)[:, 2:3] * mhi_ref[0]
              + bout_ref[0, 0])                                # (BS, 1)

        # sample_tensor(F.sigmoid(x_pred), sample=True) with pre-drawn uniforms
        samp = (jax.nn.sigmoid(xp) > u_ref[...]).astype(f32)   # (BS, 1)

        # Packed prediction output: lane 0 = x_pred, lane 1 = sample (one
        # merged store stream instead of two 1-lane outputs).
        pred_ref[...] = jnp.concatenate([xp, samp], axis=1)    # (BS, 2)

        # ---- hidden update: per-batch masked mean of h, then Linear + ReLU.
        # (static Python branch mirrors PyTorch's `if teacher_forcing:`)
        gate = x_ref[...] if teacher_forcing else samp         # (BS, 1)
        sel = sel_ref[...]                                     # (B, BS) 0/1 segments
        if fuse_gate:
            # write the gate into the padded lanes -> one matmul gives both the
            # per-batch hidden sum (lanes < H) and the gate count (lanes >= H).
            lane = lax.broadcasted_iota(jnp.int32, (1, Hp), 1)
            pad1 = (lane >= H).astype(f32)                     # 1 on padded lanes
            hg = (h + pad1) * gate                             # h is 0 on padded lanes
            full = jnp.dot(sel, hg.astype(mxu_dtype),
                           preferred_element_type=f32)         # (B, Hp)
            hsum = full
            gsum = full[:, Hp - 1:Hp]                          # (B, 1)
        else:
            hsum = jnp.dot(sel, (h * gate).astype(mxu_dtype),
                           preferred_element_type=f32)         # (B, Hp)
            gsum = jnp.dot(sel, gate.astype(mxu_dtype),
                           preferred_element_type=f32)         # (B, 1)
        # NOTE: like the PyTorch module, requires >= 1 nonzero gate per row
        # (otherwise inf/nan) — documented precondition, no guard added.
        hmean = hsum * (1.0 / gsum)                            # exact division
        hnew = jnp.dot(hmean.astype(mxu_dtype), wlin_ref[...],
                       preferred_element_type=f32) + blin_ref[...]
        hnew_ref[...] = jnp.maximum(hnew, 0.0)                 # (B, Hp) lane-dense

    return kernel


def graph_rnn_structure_forward(hidden_all_cat, x, u, params, *,
                                teacher_forcing=True, num_layers=4,
                                mxu_dtype=jnp.bfloat16):
    """hidden_all_cat: (B, H, S) [torch NCL]; x, u: (B, 1, S).

    Precondition (same as the torch module): the gating row (x when
    teacher_forcing, else the Bernoulli sample) has >= 1 nonzero per batch row.
    Assumes is_bn=True (module default): the conv bias is then cancelled by
    training-mode BatchNorm and is not applied in the kernel.
    """
    B, H, S = hidden_all_cat.shape
    BS = B * S
    L = num_layers - 1
    f32 = jnp.float32
    Hp = max(128, -(-H // 128) * 128)                    # lane-dense channel dim

    # Fold batch into the matmul M dim: (B,H,S) -> (B*S, Hp), batch-major rows,
    # zero-padded channels.
    h0 = jnp.transpose(hidden_all_cat, (0, 2, 1)).reshape(BS, H).astype(f32)
    h0 = jnp.pad(h0, ((0, 0), (0, Hp - H)))
    x_col = jnp.transpose(x, (0, 2, 1)).reshape(BS, 1).astype(f32)
    u_col = jnp.transpose(u, (0, 2, 1)).reshape(BS, 1).astype(f32)

    # Per-dilation validity masks + batch-segment matrix, built once host-side
    # (they also zero cross-batch leakage of the stacked (B*S,) layout).
    n_masks = max(L, 1)
    local_s = np.arange(BS) % S
    mlo = np.stack([(local_s >= 2 ** i).astype(np.float32) for i in range(n_masks)])
    mhi = np.stack([(local_s < S - 2 ** i).astype(np.float32) for i in range(n_masks)])
    mlo = jnp.asarray(mlo[:, :, None])                   # (n_masks, BS, 1) f32
    mhi = jnp.asarray(mhi[:, :, None])                   # (n_masks, BS, 1) f32
    sel = jnp.asarray((np.arange(BS)[None, :] // S
                       == np.arange(B)[:, None]).astype(np.float32)).astype(mxu_dtype)

    # Conv weights: (L, 3, H_in, H_out) -> zero-padded (L*3, Hp, Hp), MXU dtype.
    wc = params["wc"].astype(f32)
    w_all = jnp.zeros((L, 3, Hp, Hp), f32).at[:, :, :H, :H].set(wc)
    w_all = w_all.reshape(L * 3, Hp, Hp).astype(mxu_dtype)

    # BN affine padded with gamma=0 / beta=0 so padded channels stay zero.
    gamma = jnp.zeros((L, Hp), f32).at[:, :H].set(params["gamma"].astype(f32))
    beta = jnp.zeros((L, Hp), f32).at[:, :H].set(params["beta"].astype(f32))

    wout = jnp.zeros((Hp, 3), f32).at[:H, :].set(params["wout"].astype(f32))
    wout = wout.astype(mxu_dtype)
    bout = params["bout"].astype(f32)                    # (1, 1), SMEM scalar

    wlin = jnp.zeros((Hp, Hp), f32).at[:H, :H].set(params["wlin"].astype(f32))
    wlin = wlin.astype(mxu_dtype)
    blin = jnp.zeros((1, Hp), f32).at[:, :H].set(params["blin"].astype(f32))

    kernel = _make_kernel(num_layers, teacher_forcing, H, Hp, mxu_dtype)
    vmem = pl.BlockSpec(memory_space=pltpu.MemorySpace.VMEM)
    smem = pl.BlockSpec(memory_space=pltpu.MemorySpace.SMEM)

    out_shape = (jax.ShapeDtypeStruct((BS, 2), f32),     # [x_pred | x_pred_sample]
                 jax.ShapeDtypeStruct((B, Hp), f32))     # hidden_new (lane-dense)

    operands = (h0, x_col, u_col, mlo, mhi, sel,
                w_all, gamma, beta, wout, bout, wlin, blin)
    in_bytes = sum(int(a.size) * a.dtype.itemsize for a in operands)
    out_bytes = BS * 2 * 4 + B * Hp * 4
    est = 2 * (in_bytes + out_bytes) + 12 * BS * Hp * 4 + (2 << 20)
    vmem_limit = int(min(96 << 20, max(32 << 20, est)))

    pred, hnew = pl.pallas_call(
        kernel,
        out_shape=out_shape,
        in_specs=[vmem] * 10 + [smem] + [vmem, vmem],
        out_specs=(vmem, vmem),
        compiler_params=pltpu.CompilerParams(vmem_limit_bytes=vmem_limit),
    )(*operands)

    x_pred = pred[:, 0].reshape(B, 1, S)                 # back to torch NCL layout
    x_pred_sample = pred[:, 1].reshape(B, 1, S)
    hidden_new = hnew[:, :H][:, :, None]                 # (B, H, 1)
    return x_pred, x_pred_sample, hidden_new


def init_params(key, hidden_size, num_layers):
    """Deterministic init mirroring the module: xavier_uniform(gain=relu) for
    conv/linear weights, default-uniform biases, BN gamma=1 / beta=0."""
    gain = math.sqrt(2.0)     # nn.init.calculate_gain('relu')
    L = num_layers - 1
    keys = jax.random.split(key, 2 * L + 4)

    wc_list, bc_list = [], []
    for i in range(L):
        fan_in = hidden_size * 3
        fan_out = hidden_size * 3
        bound = gain * math.sqrt(6.0 / (fan_in + fan_out))
        w = jax.random.uniform(keys[2 * i], (hidden_size, hidden_size, 3),
                               minval=-bound, maxval=bound)        # (out, in, k)
        b = jax.random.uniform(keys[2 * i + 1], (hidden_size,),
                               minval=-1.0 / math.sqrt(fan_in),
                               maxval=1.0 / math.sqrt(fan_in))
        wc_list.append(jnp.transpose(w, (2, 1, 0)))                # (k, in, out)
        bc_list.append(b)
    wc = jnp.stack(wc_list).astype(jnp.float32)                    # (L, 3, H, H)
    # bc is kept for module-parameter fidelity but not used in the kernel:
    # training-mode BatchNorm cancels a per-channel constant bias exactly.
    bc = jnp.stack(bc_list).astype(jnp.float32)                    # (L, H)
    gamma = jnp.ones((L, hidden_size), jnp.float32)
    beta = jnp.zeros((L, hidden_size), jnp.float32)

    # conv_out: Conv1d(H, 1, k=3)
    fan_in = hidden_size * 3
    fan_out = 1 * 3
    bound = gain * math.sqrt(6.0 / (fan_in + fan_out))
    w_out = jax.random.uniform(keys[2 * L], (1, hidden_size, 3),
                               minval=-bound, maxval=bound)        # (1, H, 3)
    b_out = jax.random.uniform(keys[2 * L + 1], (1,),
                               minval=-1.0 / math.sqrt(fan_in),
                               maxval=1.0 / math.sqrt(fan_in))
    wout = w_out[0].astype(jnp.float32)                            # (H, 3)
    bout = b_out.reshape(1, 1).astype(jnp.float32)

    # linear_transition: Linear(H, H)
    bound = gain * math.sqrt(6.0 / (hidden_size + hidden_size))
    w_lin = jax.random.uniform(keys[2 * L + 2], (hidden_size, hidden_size),
                               minval=-bound, maxval=bound)        # (out, in)
    b_lin = jax.random.uniform(keys[2 * L + 3], (hidden_size,),
                               minval=-1.0 / math.sqrt(hidden_size),
                               maxval=1.0 / math.sqrt(hidden_size))
    wlin = jnp.transpose(w_lin).astype(jnp.float32)                # (in, out)
    blin = b_lin.reshape(1, hidden_size).astype(jnp.float32)

    return dict(wc=wc, bc=bc, gamma=gamma, beta=beta,
                wout=wout, bout=bout, wlin=wlin, blin=blin)


if __name__ == "__main__":
    B, H, S, NUM_LAYERS = 2, 32, 16, 4
    key = jax.random.PRNGKey(0)
    kp, kx, ku = jax.random.split(key, 3)

    params = init_params(kp, H, NUM_LAYERS)

    # self.hidden_all is a list of S ones-tensors (B, H, 1); cat(dim=2) -> ones (B, H, S)
    hidden_all_cat = jnp.ones((B, H, S), jnp.float32)

    # teacher-forcing adjacency row x: (B, 1, S) in {0, 1}, at least one 1 per row
    x = (jax.random.uniform(kx, (B, 1, S)) > 0.5).astype(jnp.float32)
    x = x.at[:, :, 0].set(1.0)

    # uniforms reproducing torch.rand inside sample_tensor
    u = jax.random.uniform(ku, (B, 1, S), dtype=jnp.float32)

    x_pred, x_pred_sample, hidden_new = graph_rnn_structure_forward(
        hidden_all_cat, x, u, params, teacher_forcing=True, num_layers=NUM_LAYERS)
    jax.block_until_ready((x_pred, x_pred_sample, hidden_new))

    assert x_pred.shape == (B, 1, S)
    assert x_pred_sample.shape == (B, 1, S)
    assert hidden_new.shape == (B, H, 1)
    assert bool(jnp.all(jnp.isfinite(x_pred)))
    assert bool(jnp.all(jnp.isfinite(hidden_new)))
    assert bool(jnp.all((x_pred_sample == 0.0) | (x_pred_sample == 1.0)))
    print("KERNEL_OK")
</pallas_src>

<mosaic_0001>
module attributes {stable_mosaic.version = 11 : i64} {
  func.func @kernel(%arg0: memref<32x128xf32, #tpu.memory_space<vmem>>, %arg1: memref<32x1xf32, #tpu.memory_space<vmem>>, %arg2: memref<32x1xf32, #tpu.memory_space<vmem>>, %arg3: memref<3x32x1xf32, #tpu.memory_space<vmem>>, %arg4: memref<3x32x1xf32, #tpu.memory_space<vmem>>, %arg5: memref<2x32xbf16, #tpu.memory_space<vmem>>, %arg6: memref<9x128x128xbf16, #tpu.memory_space<vmem>>, %arg7: memref<3x128xf32, #tpu.memory_space<vmem>>, %arg8: memref<3x128xf32, #tpu.memory_space<vmem>>, %arg9: memref<128x3xbf16, #tpu.memory_space<vmem>>, %arg10: memref<1x1xf32, #tpu.memory_space<smem>>, %arg11: memref<128x128xbf16, #tpu.memory_space<vmem>>, %arg12: memref<1x128xf32, #tpu.memory_space<vmem>>, %arg13: memref<32x2xf32, #tpu.memory_space<vmem>>, %arg14: memref<2x128xf32, #tpu.memory_space<vmem>>) attributes {dimension_semantics = [], scalar_prefetch = 0 : i64, scratch_operands = 0 : i64, tpu.core_type = #tpu.core_type<tc>} {
    %c0 = arith.constant 0 : index
    %c0_0 = arith.constant 0 : index
    %0 = vector.load %arg0[%c0, %c0_0] : memref<32x128xf32, #tpu.memory_space<vmem>>, vector<32x128xf32>
    %c0_1 = arith.constant 0 : index
    %c0_2 = arith.constant 0 : index
    %c0_3 = arith.constant 0 : index
    %1 = vector.load %arg3[%c0_1, %c0_2, %c0_3] : memref<3x32x1xf32, #tpu.memory_space<vmem>>, vector<1x32x1xf32>
    %2 = vector.shape_cast %1 : vector<1x32x1xf32> to vector<32x1xf32>
    %c0_4 = arith.constant 0 : index
    %c0_5 = arith.constant 0 : index
    %c0_6 = arith.constant 0 : index
    %3 = vector.load %arg4[%c0_4, %c0_5, %c0_6] : memref<3x32x1xf32, #tpu.memory_space<vmem>>, vector<1x32x1xf32>
    %4 = vector.shape_cast %3 : vector<1x32x1xf32> to vector<32x1xf32>
    %5 = arith.truncf %0 : vector<32x128xf32> to vector<32x128xbf16>
    %c0_7 = arith.constant 0 : index
    %c0_8 = arith.constant 0 : index
    %c0_9 = arith.constant 0 : index
    %6 = vector.load %arg6[%c0_7, %c0_8, %c0_9] : memref<9x128x128xbf16, #tpu.memory_space<vmem>>, vector<1x128x128xbf16>
    %7 = vector.shape_cast %6 : vector<1x128x128xbf16> to vector<128x128xbf16>
    %cst = arith.constant dense<0.000000e+00> : vector<32x128xf32>
    %8 = tpu.matmul %5, %7, %cst {dimension_numbers = #tpu.dot_dimension_numbers<[1], [0], [0], [1], [0, 0, 1, 1], [], []>} : vector<32x128xbf16>, vector<128x128xbf16>, vector<32x128xf32> -> vector<32x128xf32>
    %c1 = arith.constant 1 : index
    %c0_10 = arith.constant 0 : index
    %c0_11 = arith.constant 0 : index
    %9 = vector.load %arg6[%c1, %c0_10, %c0_11] : memref<9x128x128xbf16, #tpu.memory_space<vmem>>, vector<1x128x128xbf16>
    %10 = vector.shape_cast %9 : vector<1x128x128xbf16> to vector<128x128xbf16>
    %cst_12 = arith.constant dense<0.000000e+00> : vector<32x128xf32>
    %11 = tpu.matmul %5, %10, %cst_12 {dimension_numbers = #tpu.dot_dimension_numbers<[1], [0], [0], [1], [0, 0, 1, 1], [], []>} : vector<32x128xbf16>, vector<128x128xbf16>, vector<32x128xf32> -> vector<32x128xf32>
    %c2 = arith.constant 2 : index
    %c0_13 = arith.constant 0 : index
    %c0_14 = arith.constant 0 : index
    %12 = vector.load %arg6[%c2, %c0_13, %c0_14] : memref<9x128x128xbf16, #tpu.memory_space<vmem>>, vector<1x128x128xbf16>
    %13 = vector.shape_cast %12 : vector<1x128x128xbf16> to vector<128x128xbf16>
    %cst_15 = arith.constant dense<0.000000e+00> : vector<32x128xf32>
    %14 = tpu.matmul %5, %13, %cst_15 {dimension_numbers = #tpu.dot_dimension_numbers<[1], [0], [0], [1], [0, 0, 1, 1], [], []>} : vector<32x128xbf16>, vector<128x128xbf16>, vector<32x128xf32> -> vector<32x128xf32>
    %c1_i32 = arith.constant 1 : i32
    %15 = tpu.dynamic_rotate %8 by %c1_i32 dim 0 : vector<32x128xf32>, i32 -> vector<32x128xf32>
    %16 = vector.broadcast %2 : vector<32x1xf32> to vector<32x128xf32>
    %17 = arith.mulf %15, %16 : vector<32x128xf32>
    %18 = arith.addf %17, %11 : vector<32x128xf32>
    %c31_i32 = arith.constant 31 : i32
    %19 = tpu.dynamic_rotate %14 by %c31_i32 dim 0 : vector<32x128xf32>, i32 -> vector<32x128xf32>
    %20 = vector.broadcast %4 : vector<32x1xf32> to vector<32x128xf32>
    %21 = arith.mulf %19, %20 : vector<32x128xf32>
    %22 = arith.addf %18, %21 : vector<32x128xf32>
    %cst_16 = arith.constant dense<0.000000e+00> : vector<128xf32>
    %23 = vector.multi_reduction <add>, %22, %cst_16 [0] : vector<32x128xf32> to vector<128xf32>
    %24 = vector.shape_cast %23 : vector<128xf32> to vector<1x128xf32>
    %cst_17 = arith.constant 3.200000e+01 : f32
    %25 = vector.broadcast %cst_17 : f32 to vector<1x128xf32>
    %26 = arith.divf %24, %25 : vector<1x128xf32>
    %27 = arith.mulf %22, %22 : vector<32x128xf32>
    %cst_18 = arith.constant dense<0.000000e+00> : vector<128xf32>
    %28 = vector.multi_reduction <add>, %27, %cst_18 [0] : vector<32x128xf32> to vector<128xf32>
    %29 = vector.shape_cast %28 : vector<128xf32> to vector<1x128xf32>
    %cst_19 = arith.constant 3.200000e+01 : f32
    %30 = vector.broadcast %cst_19 : f32 to vector<1x128xf32>
    %31 = arith.divf %29, %30 : vector<1x128xf32>
    %32 = arith.mulf %26, %26 : vector<1x128xf32>
    %33 = arith.subf %31, %32 : vector<1x128xf32>
    %cst_20 = arith.constant 0.000000e+00 : f32
    %34 = vector.broadcast %cst_20 : f32 to vector<1x128xf32>
    %35 = arith.maximumf %33, %34 : vector<1x128xf32>
    %cst_21 = arith.constant 9.99999974E-6 : f32
    %36 = vector.broadcast %cst_21 : f32 to vector<1x128xf32>
    %37 = arith.addf %35, %36 : vector<1x128xf32>
    %38 = math.rsqrt %37 : vector<1x128xf32>
    %c0_22 = arith.constant 0 : index
    %c0_23 = arith.constant 0 : index
    %39 = vector.load %arg7[%c0_22, %c0_23] : memref<3x128xf32, #tpu.memory_space<vmem>>, vector<1x128xf32>
    %40 = arith.mulf %38, %39 : vector<1x128xf32>
    %c0_24 = arith.constant 0 : index
    %c0_25 = arith.constant 0 : index
    %41 = vector.load %arg8[%c0_24, %c0_25] : memref<3x128xf32, #tpu.memory_space<vmem>>, vector<1x128xf32>
    %42 = arith.mulf %26, %40 : vector<1x128xf32>
    %43 = arith.subf %41, %42 : vector<1x128xf32>
    %44 = vector.broadcast %40 : vector<1x128xf32> to vector<32x128xf32>
    %45 = arith.mulf %22, %44 : vector<32x128xf32>
    %46 = vector.broadcast %43 : vector<1x128xf32> to vector<32x128xf32>
    %47 = arith.addf %45, %46 : vector<32x128xf32>
    %cst_26 = arith.constant 0.000000e+00 : f32
    %48 = vector.broadcast %cst_26 : f32 to vector<32x128xf32>
    %49 = arith.maximumf %47, %48 : vector<32x128xf32>
    %c1_27 = arith.constant 1 : index
    %c0_28 = arith.constant 0 : index
    %c0_29 = arith.constant 0 : index
    %50 = vector.load %arg3[%c1_27, %c0_28, %c0_29] : memref<3x32x1xf32, #tpu.memory_space<vmem>>, vector<1x32x1xf32>
    %51 = vector.shape_cast %50 : vector<1x32x1xf32> to vector<32x1xf32>
    %c1_30 = arith.constant 1 : index
    %c0_31 = arith.constant 0 : index
    %c0_32 = arith.constant 0 : index
    %52 = vector.load %arg4[%c1_30, %c0_31, %c0_32] : memref<3x32x1xf32, #tpu.memory_space<vmem>>, vector<1x32x1xf32>
    %53 = vector.shape_cast %52 : vector<1x32x1xf32> to vector<32x1xf32>
    %54 = arith.truncf %49 : vector<32x128xf32> to vector<32x128xbf16>
    %c3 = arith.constant 3 : index
    %c0_33 = arith.constant 0 : index
    %c0_34 = arith.constant 0 : index
    %55 = vector.load %arg6[%c3, %c0_33, %c0_34] : memref<9x128x128xbf16, #tpu.memory_space<vmem>>, vector<1x128x128xbf16>
    %56 = vector.shape_cast %55 : vector<1x128x128xbf16> to vector<128x128xbf16>
    %cst_35 = arith.constant dense<0.000000e+00> : vector<32x128xf32>
    %57 = tpu.matmul %54, %56, %cst_35 {dimension_numbers = #tpu.dot_dimension_numbers<[1], [0], [0], [1], [0, 0, 1, 1], [], []>} : vector<32x128xbf16>, vector<128x128xbf16>, vector<32x128xf32> -> vector<32x128xf32>
    %c4 = arith.constant 4 : index
    %c0_36 = arith.constant 0 : index
    %c0_37 = arith.constant 0 : index
    %58 = vector.load %arg6[%c4, %c0_36, %c0_37] : memref<9x128x128xbf16, #tpu.memory_space<vmem>>, vector<1x128x128xbf16>
    %59 = vector.shape_cast %58 : vector<1x128x128xbf16> to vector<128x128xbf16>
    %cst_38 = arith.constant dense<0.000000e+00> : vector<32x128xf32>
    %60 = tpu.matmul %54, %59, %cst_38 {dimension_numbers = #tpu.dot_dimension_numbers<[1], [0], [0], [1], [0, 0, 1, 1], [], []>} : vector<32x128xbf16>, vector<128x128xbf16>, vector<32x128xf32> -> vector<32x128xf32>
    %c5 = arith.constant 5 : index
    %c0_39 = arith.constant 0 : index
    %c0_40 = arith.constant 0 : index
    %61 = vector.load %arg6[%c5, %c0_39, %c0_40] : memref<9x128x128xbf16, #tpu.memory_space<vmem>>, vector<1x128x128xbf16>
    %62 = vector.shape_cast %61 : vector<1x128x128xbf16> to vector<128x128xbf16>
    %cst_41 = arith.constant dense<0.000000e+00> : vector<32x128xf32>
    %63 = tpu.matmul %54, %62, %cst_41 {dimension_numbers = #tpu.dot_dimension_numbers<[1], [0], [0], [1], [0, 0, 1, 1], [], []>} : vector<32x128xbf16>, vector<128x128xbf16>, vector<32x128xf32> -> vector<32x128xf32>
    %c2_i32 = arith.constant 2 : i32
    %64 = tpu.dynamic_rotate %57 by %c2_i32 dim 0 : vector<32x128xf32>, i32 -> vector<32x128xf32>
    %65 = vector.broadcast %51 : vector<32x1xf32> to vector<32x128xf32>
    %66 = arith.mulf %64, %65 : vector<32x128xf32>
    %67 = arith.addf %66, %60 : vector<32x128xf32>
    %c30_i32 = arith.constant 30 : i32
    %68 = tpu.dynamic_rotate %63 by %c30_i32 dim 0 : vector<32x128xf32>, i32 -> vector<32x128xf32>
    %69 = vector.broadcast %53 : vector<32x1xf32> to vector<32x128xf32>
    %70 = arith.mulf %68, %69 : vector<32x128xf32>
    %71 = arith.addf %67, %70 : vector<32x128xf32>
    %cst_42 = arith.constant dense<0.000000e+00> : vector<128xf32>
    %72 = vector.multi_reduction <add>, %71, %cst_42 [0] : vector<32x128xf32> to vector<128xf32>
    %73 = vector.shape_cast %72 : vector<128xf32> to vector<1x128xf32>
    %cst_43 = arith.constant 3.200000e+01 : f32
    %74 = vector.broadcast %cst_43 : f32 to vector<1x128xf32>
    %75 = arith.divf %73, %74 : vector<1x128xf32>
    %76 = arith.mulf %71, %71 : vector<32x128xf32>
    %cst_44 = arith.constant dense<0.000000e+00> : vector<128xf32>
    %77 = vector.multi_reduction <add>, %76, %cst_44 [0] : vector<32x128xf32> to vector<128xf32>
    %78 = vector.shape_cast %77 : vector<128xf32> to vector<1x128xf32>
    %cst_45 = arith.constant 3.200000e+01 : f32
    %79 = vector.broadcast %cst_45 : f32 to vector<1x128xf32>
    %80 = arith.divf %78, %79 : vector<1x128xf32>
    %81 = arith.mulf %75, %75 : vector<1x128xf32>
    %82 = arith.subf %80, %81 : vector<1x128xf32>
    %cst_46 = arith.constant 0.000000e+00 : f32
    %83 = vector.broadcast %cst_46 : f32 to vector<1x128xf32>
    %84 = arith.maximumf %82, %83 : vector<1x128xf32>
    %cst_47 = arith.constant 9.99999974E-6 : f32
    %85 = vector.broadcast %cst_47 : f32 to vector<1x128xf32>
    %86 = arith.addf %84, %85 : vector<1x128xf32>
    %87 = math.rsqrt %86 : vector<1x128xf32>
    %c1_48 = arith.constant 1 : index
    %c0_49 = arith.constant 0 : index
    %88 = vector.load %arg7[%c1_48, %c0_49] : memref<3x128xf32, #tpu.memory_space<vmem>>, vector<1x128xf32>
    %89 = arith.mulf %87, %88 : vector<1x128xf32>
    %c1_50 = arith.constant 1 : index
    %c0_51 = arith.constant 0 : index
    %90 = vector.load %arg8[%c1_50, %c0_51] : memref<3x128xf32, #tpu.memory_space<vmem>>, vector<1x128xf32>
    %91 = arith.mulf %75, %89 : vector<1x128xf32>
    %92 = arith.subf %90, %91 : vector<1x128xf32>
    %93 = vector.broadcast %89 : vector<1x128xf32> to vector<32x128xf32>
    %94 = arith.mulf %71, %93 : vector<32x128xf32>
    %95 = vector.broadcast %92 : vector<1x128xf32> to vector<32x128xf32>
    %96 = arith.addf %94, %95 : vector<32x128xf32>
    %cst_52 = arith.constant 0.000000e+00 : f32
    %97 = vector.broadcast %cst_52 : f32 to vector<32x128xf32>
    %98 = arith.maximumf %96, %97 : vector<32x128xf32>
    %c2_53 = arith.constant 2 : index
    %c0_54 = arith.constant 0 : index
    %c0_55 = arith.constant 0 : index
    %99 = vector.load %arg3[%c2_53, %c0_54, %c0_55] : memref<3x32x1xf32, #tpu.memory_space<vmem>>, vector<1x32x1xf32>
    %100 = vector.shape_cast %99 : vector<1x32x1xf32> to vector<32x1xf32>
    %c2_56 = arith.constant 2 : index
    %c0_57 = arith.constant 0 : index
    %c0_58 = arith.constant 0 : index
    %101 = vector.load %arg4[%c2_56, %c0_57, %c0_58] : memref<3x32x1xf32, #tpu.memory_space<vmem>>, vector<1x32x1xf32>
    %102 = vector.shape_cast %101 : vector<1x32x1xf32> to vector<32x1xf32>
    %103 = arith.truncf %98 : vector<32x128xf32> to vector<32x128xbf16>
    %c6 = arith.constant 6 : index
    %c0_59 = arith.constant 0 : index
    %c0_60 = arith.constant 0 : index
    %104 = vector.load %arg6[%c6, %c0_59, %c0_60] : memref<9x128x128xbf16, #tpu.memory_space<vmem>>, vector<1x128x128xbf16>
    %105 = vector.shape_cast %104 : vector<1x128x128xbf16> to vector<128x128xbf16>
    %cst_61 = arith.constant dense<0.000000e+00> : vector<32x128xf32>
    %106 = tpu.matmul %103, %105, %cst_61 {dimension_numbers = #tpu.dot_dimension_numbers<[1], [0], [0], [1], [0, 0, 1, 1], [], []>} : vector<32x128xbf16>, vector<128x128xbf16>, vector<32x128xf32> -> vector<32x128xf32>
    %c7 = arith.constant 7 : index
    %c0_62 = arith.constant 0 : index
    %c0_63 = arith.constant 0 : index
    %107 = vector.load %arg6[%c7, %c0_62, %c0_63] : memref<9x128x128xbf16, #tpu.memory_space<vmem>>, vector<1x128x128xbf16>
    %108 = vector.shape_cast %107 : vector<1x128x128xbf16> to vector<128x128xbf16>
    %cst_64 = arith.constant dense<0.000000e+00> : vector<32x128xf32>
    %109 = tpu.matmul %103, %108, %cst_64 {dimension_numbers = #tpu.dot_dimension_numbers<[1], [0], [0], [1], [0, 0, 1, 1], [], []>} : vector<32x128xbf16>, vector<128x128xbf16>, vector<32x128xf32> -> vector<32x128xf32>
    %c8 = arith.constant 8 : index
    %c0_65 = arith.constant 0 : index
    %c0_66 = arith.constant 0 : index
    %110 = vector.load %arg6[%c8, %c0_65, %c0_66] : memref<9x128x128xbf16, #tpu.memory_space<vmem>>, vector<1x128x128xbf16>
    %111 = vector.shape_cast %110 : vector<1x128x128xbf16> to vector<128x128xbf16>
    %cst_67 = arith.constant dense<0.000000e+00> : vector<32x128xf32>
    %112 = tpu.matmul %103, %111, %cst_67 {dimension_numbers = #tpu.dot_dimension_numbers<[1], [0], [0], [1], [0, 0, 1, 1], [], []>} : vector<32x128xbf16>, vector<128x128xbf16>, vector<32x128xf32> -> vector<32x128xf32>
    %c4_i32 = arith.constant 4 : i32
    %113 = tpu.dynamic_rotate %106 by %c4_i32 dim 0 : vector<32x128xf32>, i32 -> vector<32x128xf32>
    %114 = vector.broadcast %100 : vector<32x1xf32> to vector<32x128xf32>
    %115 = arith.mulf %113, %114 : vector<32x128xf32>
    %116 = arith.addf %115, %109 : vector<32x128xf32>
    %c28_i32 = arith.constant 28 : i32
    %117 = tpu.dynamic_rotate %112 by %c28_i32 dim 0 : vector<32x128xf32>, i32 -> vector<32x128xf32>
    %118 = vector.broadcast %102 : vector<32x1xf32> to vector<32x128xf32>
    %119 = arith.mulf %117, %118 : vector<32x128xf32>
    %120 = arith.addf %116, %119 : vector<32x128xf32>
    %cst_68 = arith.constant dense<0.000000e+00> : vector<128xf32>
    %121 = vector.multi_reduction <add>, %120, %cst_68 [0] : vector<32x128xf32> to vector<128xf32>
    %122 = vector.shape_cast %121 : vector<128xf32> to vector<1x128xf32>
    %cst_69 = arith.constant 3.200000e+01 : f32
    %123 = vector.broadcast %cst_69 : f32 to vector<1x128xf32>
    %124 = arith.divf %122, %123 : vector<1x128xf32>
    %125 = arith.mulf %120, %120 : vector<32x128xf32>
    %cst_70 = arith.constant dense<0.000000e+00> : vector<128xf32>
    %126 = vector.multi_reduction <add>, %125, %cst_70 [0] : vector<32x128xf32> to vector<128xf32>
    %127 = vector.shape_cast %126 : vector<128xf32> to vector<1x128xf32>
    %cst_71 = arith.constant 3.200000e+01 : f32
    %128 = vector.broadcast %cst_71 : f32 to vector<1x128xf32>
    %129 = arith.divf %127, %128 : vector<1x128xf32>
    %130 = arith.mulf %124, %124 : vector<1x128xf32>
    %131 = arith.subf %129, %130 : vector<1x128xf32>
    %cst_72 = arith.constant 0.000000e+00 : f32
    %132 = vector.broadcast %cst_72 : f32 to vector<1x128xf32>
    %133 = arith.maximumf %131, %132 : vector<1x128xf32>
    %cst_73 = arith.constant 9.99999974E-6 : f32
    %134 = vector.broadcast %cst_73 : f32 to vector<1x128xf32>
    %135 = arith.addf %133, %134 : vector<1x128xf32>
    %136 = math.rsqrt %135 : vector<1x128xf32>
    %c2_74 = arith.constant 2 : index
    %c0_75 = arith.constant 0 : index
    %137 = vector.load %arg7[%c2_74, %c0_75] : memref<3x128xf32, #tpu.memory_space<vmem>>, vector<1x128xf32>
    %138 = arith.mulf %136, %137 : vector<1x128xf32>
    %c2_76 = arith.constant 2 : index
    %c0_77 = arith.constant 0 : index
    %139 = vector.load %arg8[%c2_76, %c0_77] : memref<3x128xf32, #tpu.memory_space<vmem>>, vector<1x128xf32>
    %140 = arith.mulf %124, %138 : vector<1x128xf32>
    %141 = arith.subf %139, %140 : vector<1x128xf32>
    %142 = vector.broadcast %138 : vector<1x128xf32> to vector<32x128xf32>
    %143 = arith.mulf %120, %142 : vector<32x128xf32>
    %144 = vector.broadcast %141 : vector<1x128xf32> to vector<32x128xf32>
    %145 = arith.addf %143, %144 : vector<32x128xf32>
    %cst_78 = arith.constant 0.000000e+00 : f32
    %146 = vector.broadcast %cst_78 : f32 to vector<32x128xf32>
    %147 = arith.maximumf %145, %146 : vector<32x128xf32>
    %148 = arith.truncf %147 : vector<32x128xf32> to vector<32x128xbf16>
    %c0_79 = arith.constant 0 : index
    %c0_80 = arith.constant 0 : index
    %149 = vector.load %arg9[%c0_79, %c0_80] : memref<128x3xbf16, #tpu.memory_space<vmem>>, vector<128x3xbf16>
    %cst_81 = arith.constant dense<0.000000e+00> : vector<32x3xf32>
    %150 = tpu.matmul %148, %149, %cst_81 {dimension_numbers = #tpu.dot_dimension_numbers<[1], [0], [0], [1], [0, 0, 1, 1], [], []>} : vector<32x128xbf16>, vector<128x3xbf16>, vector<32x3xf32> -> vector<32x3xf32>
    %c1_i32_82 = arith.constant 1 : i32
    %151 = tpu.dynamic_rotate %150 by %c1_i32_82 dim 0 : vector<32x3xf32>, i32 -> vector<32x3xf32>
    %152 = vector.extract_strided_slice %151 {offsets = [0, 0], sizes = [32, 1], strides = [1, 1]} : vector<32x3xf32> to vector<32x1xf32>
    %c0_83 = arith.constant 0 : index
    %c0_84 = arith.constant 0 : index
    %c0_85 = arith.constant 0 : index
    %153 = vector.load %arg3[%c0_83, %c0_84, %c0_85] : memref<3x32x1xf32, #tpu.memory_space<vmem>>, vector<1x32x1xf32>
    %154 = vector.shape_cast %153 : vector<1x32x1xf32> to vector<32x1xf32>
    %155 = arith.mulf %152, %154 : vector<32x1xf32>
    %156 = vector.extract_strided_slice %150 {offsets = [0, 1], sizes = [32, 1], strides = [1, 1]} : vector<32x3xf32> to vector<32x1xf32>
    %157 = arith.addf %155, %156 : vector<32x1xf32>
    %c31_i32_86 = arith.constant 31 : i32
    %158 = tpu.dynamic_rotate %150 by %c31_i32_86 dim 0 : vector<32x3xf32>, i32 -> vector<32x3xf32>
    %159 = vector.extract_strided_slice %158 {offsets = [0, 2], sizes = [32, 1], strides = [1, 1]} : vector<32x3xf32> to vector<32x1xf32>
    %c0_87 = arith.constant 0 : index
    %c0_88 = arith.constant 0 : index
    %c0_89 = arith.constant 0 : index
    %160 = vector.load %arg4[%c0_87, %c0_88, %c0_89] : memref<3x32x1xf32, #tpu.memory_space<vmem>>, vector<1x32x1xf32>
    %161 = vector.shape_cast %160 : vector<1x32x1xf32> to vector<32x1xf32>
    %162 = arith.mulf %159, %161 : vector<32x1xf32>
    %163 = arith.addf %157, %162 : vector<32x1xf32>
    %c0_90 = arith.constant 0 : index
    %c0_91 = arith.constant 0 : index
    %164 = memref.load %arg10[%c0_90, %c0_91] : memref<1x1xf32, #tpu.memory_space<smem>>
    %165 = vector.broadcast %164 : f32 to vector<32x1xf32>
    %166 = arith.addf %163, %165 : vector<32x1xf32>
    %167 = arith.negf %166 : vector<32x1xf32>
    %168 = math.exp %167 : vector<32x1xf32>
    %cst_92 = arith.constant 1.000000e+00 : f32
    %169 = vector.broadcast %cst_92 : f32 to vector<32x1xf32>
    %170 = arith.addf %169, %168 : vector<32x1xf32>
    %171 = arith.divf %169, %170 : vector<32x1xf32>
    %c0_93 = arith.constant 0 : index
    %c0_94 = arith.constant 0 : index
    %172 = vector.load %arg2[%c0_93, %c0_94] : memref<32x1xf32, #tpu.memory_space<vmem>>, vector<32x1xf32>
    %173 = arith.cmpf ogt, %171, %172 : vector<32x1xf32>
    %174 = arith.extui %173 : vector<32x1xi1> to vector<32x1xi32>
    %175 = arith.sitofp %174 : vector<32x1xi32> to vector<32x1xf32>
    %176 = tpu.concatenate %166, %175 in 1 : vector<32x1xf32>, vector<32x1xf32> -> vector<32x2xf32>
    %c0_95 = arith.constant 0 : index
    %c0_96 = arith.constant 0 : index
    %177 = vector.load %arg13[%c0_95, %c0_96] : memref<32x2xf32, #tpu.memory_space<vmem>>, vector<32x2xf32>
    tpu.vector_store %arg13[%c0_95, %c0_96], %176 {strides = array<i32>} : memref<32x2xf32, #tpu.memory_space<vmem>>, vector<32x2xf32>,
    %c0_97 = arith.constant 0 : index
    %c0_98 = arith.constant 0 : index
    %178 = vector.load %arg1[%c0_97, %c0_98] : memref<32x1xf32, #tpu.memory_space<vmem>>, vector<32x1xf32>
    %c0_99 = arith.constant 0 : index
    %c0_100 = arith.constant 0 : index
    %179 = vector.load %arg5[%c0_99, %c0_100] : memref<2x32xbf16, #tpu.memory_space<vmem>>, vector<2x32xbf16>
    %180 = tpu.iota {dimensions = array<i32: 1>} : vector<1x128xi32>
    %c32_i32 = arith.constant 32 : i32
    %181 = vector.broadcast %c32_i32 : i32 to vector<1x128xi32>
    %182 = arith.cmpi sge, %180, %181 : vector<1x128xi32>
    %183 = arith.extui %182 : vector<1x128xi1> to vector<1x128xi32>
    %184 = arith.sitofp %183 : vector<1x128xi32> to vector<1x128xf32>
    %185 = vector.broadcast %184 : vector<1x128xf32> to vector<32x128xf32>
    %186 = arith.addf %147, %185 : vector<32x128xf32>
    %187 = vector.broadcast %178 : vector<32x1xf32> to vector<32x128xf32>
    %188 = arith.mulf %186, %187 : vector<32x128xf32>
    %189 = arith.truncf %188 : vector<32x128xf32> to vector<32x128xbf16>
    %cst_101 = arith.constant dense<0.000000e+00> : vector<2x128xf32>
    %190 = tpu.matmul %179, %189, %cst_101 {dimension_numbers = #tpu.dot_dimension_numbers<[1], [0], [0], [1], [0, 0, 1, 1], [], []>} : vector<2x32xbf16>, vector<32x128xbf16>, vector<2x128xf32> -> vector<2x128xf32>
    %191 = vector.extract_strided_slice %190 {offsets = [0, 127], sizes = [2, 1], strides = [1, 1]} : vector<2x128xf32> to vector<2x1xf32>
    %cst_102 = arith.constant 1.000000e+00 : f32
    %192 = vector.broadcast %cst_102 : f32 to vector<2x1xf32>
    %193 = arith.divf %192, %191 : vector<2x1xf32>
    %194 = vector.broadcast %193 : vector<2x1xf32> to vector<2x128xf32>
    %195 = arith.mulf %190, %194 : vector<2x128xf32>
    %196 = arith.truncf %195 : vector<2x128xf32> to vector<2x128xbf16>
    %c0_103 = arith.constant 0 : index
    %c0_104 = arith.constant 0 : index
    %197 = vector.load %arg11[%c0_103, %c0_104] : memref<128x128xbf16, #tpu.memory_space<vmem>>, vector<128x128xbf16>
    %cst_105 = arith.constant dense<0.000000e+00> : vector<2x128xf32>
    %198 = tpu.matmul %196, %197, %cst_105 {dimension_numbers = #tpu.dot_dimension_numbers<[1], [0], [0], [1], [0, 0, 1, 1], [], []>} : vector<2x128xbf16>, vector<128x128xbf16>, vector<2x128xf32> -> vector<2x128xf32>
    %c0_106 = arith.constant 0 : index
    %c0_107 = arith.constant 0 : index
    %199 = vector.load %arg12[%c0_106, %c0_107] : memref<1x128xf32, #tpu.memory_space<vmem>>, vector<1x128xf32>
    %200 = vector.broadcast %199 : vector<1x128xf32> to vector<2x128xf32>
    %201 = arith.addf %198, %200 : vector<2x128xf32>
    %cst_108 = arith.constant 0.000000e+00 : f32
    %202 = vector.broadcast %cst_108 : f32 to vector<2x128xf32>
    %203 = arith.maximumf %201, %202 : vector<2x128xf32>
    %c0_109 = arith.constant 0 : index
    %c0_110 = arith.constant 0 : index
    %204 = vector.load %arg14[%c0_109, %c0_110] : memref<2x128xf32, #tpu.memory_space<vmem>>, vector<2x128xf32>
    tpu.vector_store %arg14[%c0_109, %c0_110], %203 {strides = array<i32>} : memref<2x128xf32, #tpu.memory_space<vmem>>, vector<2x128xf32>,
    return
  }
}

</mosaic_0001>

<bundles_post_ra>
// kernel: tpu_custom_call.1
= control target key start
LH: loop header
LB: loop body
LE: loop exit
PB: predicated region body
PF: predicated region fallthrough
CT: control target
= control target key end

     0   :  { %21 = vsyncpa [#allocation4], 0  ;;  %s3094_s0 = inlined_call_operand.vmem [shape: f32[32,128], index: 0, kind: input, shape index: {}]   ;;  %s3095_s1 = inlined_call_operand.vmem [shape: f32[32,1], index: 1, kind: input, shape index: {}]   ;;  %s3096_s2 = inlined_call_operand.vmem [shape: f32[32,1], index: 2, kind: input, shape index: {}]   ;;  %s3097_s3 = inlined_call_operand.vmem [shape: f32[3,32,1], index: 3, kind: input, shape index: {}]   ;;  %s3098_s4 = inlined_call_operand.vmem [shape: f32[3,32,1], index: 4, kind: input, shape index: {}]   ;;  %s3099_s5 = inlined_call_operand.vmem [shape: bf16[2,32], index: 5, kind: input, shape index: {}]   ;;  %s3100_s6 = inlined_call_operand.hbm [shape: bf16[9,128,128], index: 6, kind: input, shape index: {}]   ;;  %s3101_s7 = inlined_call_operand.vmem [shape: f32[3,128], index: 7, kind: input, shape index: {}]   ;;  %s3102_s8 = inlined_call_operand.vmem [shape: f32[3,128], index: 8, kind: input, shape index: {}]   ;;  %s3103_s9 = inlined_call_operand.vmem [shape: bf16[128,3], index: 9, kind: input, shape index: {}]   ;;  %s3104_s10 = inlined_call_operand.<no memory space> [shape: f32[1,1], index: 10, kind: input, shape index: {}]   ;;  %s3105_s11 = inlined_call_operand.vmem [shape: bf16[128,128], index: 11, kind: input, shape index: {}]   ;;  %s3106_s12 = inlined_call_operand.vmem [shape: f32[1,128], index: 12, kind: input, shape index: {}]   ;;  %s3107_s13 = inlined_call_operand.vmem [shape: f32[32,2], index: 13, kind: output, shape index: {0}]   ;;  %s3108_s14 = inlined_call_operand.hbm [shape: f32[2,128], index: 14, kind: output, shape index: {1}]  }
   0x1   :  { %22 = vsyncpa [#allocation5], 0  ;;  %s2644_s29 = smov [#allocation3]  }
   0x2   :  { %s40_s30 = sshll.u32 %s2644_s29, 4  ;;  %s41_s30 = int_to_ptr.vmem [resolvable:$true] %s40_s30 }
   0x3   :  { %s2608_s15 = scalar_lea.vmem %s41_s30, 9216  ;;  %p2613_p1 = scmp.lt.s32.totalorder %s41_s30, %s41_s30 }
   0x4   :  { %p2609_p0 = scmp.ne.s32.totalorder %s41_s30, %s2608_s15  ;;  %p2614_p2 = scmp.lt.s32.totalorder %s2608_s15, %s2608_s15 }
   0x6   :  { %p2615_p3 = por %p2614_p2, %p2613_p1 }
   0x8   :  { %p2616_p4 = pnand %p2615_p3, %p2609_p0 }
   0xa   :  { %2619 = shalt.err (!%p2616_p4)
}
   0xb   :  { %s2645_s16 = smov 64   ;;  %s2646_s17 = smov 4  }
   0xc   :  { %46 = dma.hbm_to_vmem [thread:$0]  %s3100_s6, 9216, %s41_s30, [#allocation4], %s2645_s16, %s2645_s16, %s2646_s17  }
   0xd   :  { %2640 = dma.done.wait [#allocation4], 9216  }
   0xe   :  { %2641 = vsyncadd [#allocation4], 4294958080  ;;  %v2647_v0 = vmov 0   ;;  %v2480_v1 = vld [vmem:[#allocation3 + $0x38] sm:$0xff]   ;;  %v2481_v2 = vld [vmem:[#allocation3 + $0x30] sm:$0xff]   ;;  %vm2649_vm4 = vmmov 0  }
   0xf   :  { %2467 = vset.pattern.permute.xlu0 %v2647_v0  ;;  %2468 = vset.pattern.permute.xlu1 %v2647_v0  ;;  %v2482_v3 = vld [vmem:[#allocation3 + $0x78] sm:$0xff]   ;;  %v2483_v4 = vld [vmem:[#allocation3 + $0x28] sm:$0xff]   ;;  %v2484_v5 = vld [vmem:[#allocation3 + $0x70] sm:$0xff]   ;;  %s2650_s19 = smov 2   ;;  %vm1815_vm7 = vcmask 261120   ;;  %s2652_s15 = smov 127  }
  0x10   :  { %2227 = vmatprep.subr.bf16.mxu0 %v2480_v1  ;;  %2247 = vmatprep.subr.bf16.mxu1 %v2482_v3  ;;  %v2486_v6 = vld [vmem:[#allocation3 + $0x68] sm:$0xff]   ;;  %v2485_v7 = vld [vmem:[#allocation3 + $0x20] sm:$0xff]   ;;  %v2487_v9 = vld [vmem:[#allocation3 + $0x18] sm:$0xff]   ;;  %s2654_s30 = smov 1   ;;  %vm1765_vm12 = vcmask 7168   ;;  %vm1770_vm13 = vcmask 15360  }
  0x11   :  { %2228 = vmatpush3.bf16.msra.mxu0 %v2480_v1  ;;  %2248 = vmatpush3.bf16.msra.mxu1 %v2482_v3  ;;  %v2488_v8 = vld [vmem:[#allocation3 + $0x60] sm:$0xff]   ;;  %v2490_v10 = vld [vmem:[#allocation3 + $0x58] sm:$0xff]   ;;  %v64_v12 = vld [vmem:[%s3094_s0 + $0x8] sm:$0xff]  ;;  %s2655_s22 = smov [#allocation6]  }
  0x12   :  { %2229 = vmatprep.subr.bf16.mxu0 %v2481_v2  ;;  %2249 = vmatprep.subr.bf16.mxu1 %v2484_v5  ;;  %v63_v11 = vld [vmem:[%s3094_s0] sm:$0xff]  ;;  %v2489_v13 = vld [vmem:[#allocation3 + $0x10] sm:$0xff]   ;;  %v2491_v16 = vld [vmem:[#allocation3 + $0x8] sm:$0xff]   ;;  %s1989_s23 = sshll.u32 %s2655_s22, 4  ;;  %s1990_s23 = int_to_ptr.vmem [resolvable:$true] %s1989_s23 }
  0x13   :  { %v75_v14 = vpack.c.bf16 %v64_v12, %v63_v11  ;;  %v2492_v15 = vld [vmem:[#allocation3 + $0x50] sm:$0xff]   ;;  %v2494_v17 = vld [vmem:[#allocation3 + $0x48] sm:$0xff]   ;;  %v2493_v18 = vld [vmem:[#allocation3] sm:$0xff]   ;;  %s2620_s24 = scalar_lea.vmem %s1990_s23, 32  ;;  %p2625_p6 = scmp.lt.s32.totalorder %s1990_s23, %s1990_s23 }
  0x14   :  { %v67_v19 = vld [vmem:[%s3097_s3] sm:$0xff]  ;;  %v69_v20 = vld [vmem:[%s3097_s3 + $0x10] sm:$0xff]  ;;  %v66_v23 = vld [vmem:[%s3094_s0 + $0x18] sm:$0xff]  ;;  %p2621_p5 = scmp.ne.s32.totalorder %s1990_s23, %s2620_s24  ;;  %p2626_p7 = scmp.lt.s32.totalorder %s2620_s24, %s2620_s24 }
  0x15   :  { %2230 = vmatpush3.bf16.msra.mxu0 %v2481_v2  ;;  %2250 = vmatpush3.bf16.msra.mxu1 %v2484_v5  ;;  %v2496_v21 = vld [vmem:[#allocation3 + $0x40] sm:$0xff]   ;;  %v65_v22 = vld [vmem:[%s3094_s0 + $0x10] sm:$0xff]  ;;  %v68_v24 = vld [vmem:[%s3097_s3 + $0x8] sm:$0xff]  ;;  %s2653_s0 = smov 126  }
  0x16   :  { %2231 = vmatprep.subr.bf16.mxu0 %v2483_v4  ;;  %2251 = vmatprep.subr.bf16.mxu1 %v2486_v6  ;;  %v2495_v25 = vld [vmem:[#allocation3 + $0xb8] sm:$0xff]   ;;  %v71_v26 = vld [vmem:[%s3098_s4] sm:$0xff]  ;;  %v2758_v27 = vpack.c.bf16 %v66_v23, %v65_v22  ;;  %v72_v28 = vld [vmem:[%s3098_s4 + $0x8] sm:$0xff]  ;;  %p2627_p8 = por %p2626_p7, %p2625_p6 }
  0x17   :  { %2243 = vmatprep.mubr.bf16.mxu0 %v75_v14  ;;  %2263 = vmatprep.mubr.bf16.mxu1 %v75_v14  ;;  %v2497_v29 = vld [vmem:[#allocation3 + $0xb0] sm:$0xff]   ;;  %v2498_v30 = vld [vmem:[#allocation3 + $0xa8] sm:$0xff]   ;;  %v70_v31 = vld [vmem:[%s3097_s3 + $0x18] sm:$0xff] }
  0x18   :  { %431 = vperm.xlu0 %2467, %v67_v19   ;;  %441 = vperm.xlu1 %2468, %v69_v20   ;;  %v73_v32 = vld [vmem:[%s3098_s4 + $0x10] sm:$0xff]  ;;  %v74_v33 = vld [vmem:[%s3098_s4 + $0x18] sm:$0xff]  ;;  %v2024_v34 = vld [vmem:[%s3097_s3 + $0x20] sm:$0xff]  ;;  %p2628_p9 = pnand %p2627_p8, %p2621_p5 }
  0x19   :  { %2232 = vmatpush3.bf16.msra.mxu0 %v2483_v4  ;;  %2252 = vmatpush3.bf16.msra.mxu1 %v2486_v6  ;;  %v2499_v35 = vld [vmem:[#allocation3 + $0xa0] sm:$0xff]   ;;  %v2025_v36 = vld [vmem:[%s3097_s3 + $0x28] sm:$0xff]  ;;  %v2026_v37 = vld [vmem:[%s3097_s3 + $0x30] sm:$0xff] }
  0x1a   :  { %2233 = vmatprep.subr.bf16.mxu0 %v2485_v7  ;;  %2253 = vmatprep.subr.bf16.mxu1 %v2488_v8  ;;  %v2500_v38 = vld [vmem:[#allocation3 + $0x98] sm:$0xff]   ;;  %v2028_v39 = vld [vmem:[%s3098_s4 + $0x20] sm:$0xff]  ;;  %v2029_v40 = vld [vmem:[%s3098_s4 + $0x28] sm:$0xff] }
  0x1b   :  { %v2501_v41 = vld [vmem:[#allocation3 + $0x90] sm:$0xff]   ;;  %v2027_v42 = vld [vmem:[%s3097_s3 + $0x38] sm:$0xff]  ;;  %v2502_v44 = vld [vmem:[#allocation3 + $0x88] sm:$0xff]  }
  0x1c   :  { %436 = vperm.xlu0 %2467, %v68_v24   ;;  %468 = vperm.xlu1 %2468, %v71_v26   ;;  %v2030_v43 = vld [vmem:[%s3098_s4 + $0x30] sm:$0xff]  ;;  %v2031_v45 = vld [vmem:[%s3098_s4 + $0x38] sm:$0xff]  ;;  %v2056_v46 = vld [vmem:[%s3097_s3 + $0x40] sm:$0xff] }
  0x1d   :  { %2234 = vmatpush3.bf16.msra.mxu0 %v2485_v7  ;;  %2254 = vmatpush3.bf16.msra.mxu1 %v2488_v8  ;;  %v2503_v47 = vld [vmem:[#allocation3 + $0x80] sm:$0xff]   ;;  %v2057_v48 = vld [vmem:[%s3097_s3 + $0x48] sm:$0xff]  ;;  %v2058_v49 = vld [vmem:[%s3097_s3 + $0x50] sm:$0xff] }
  0x1e   :  { %2235 = vmatprep.subr.bf16.mxu0 %v2487_v9  ;;  %2255 = vmatprep.subr.bf16.mxu1 %v2490_v10  ;;  %v2060_v50 = vld [vmem:[%s3098_s4 + $0x40] sm:$0xff]  ;;  %v2061_v51 = vld [vmem:[%s3098_s4 + $0x48] sm:$0xff]  ;;  %v2059_v52 = vld [vmem:[%s3097_s3 + $0x58] sm:$0xff] }
  0x1f   :  { %v2062_v53 = vld [vmem:[%s3098_s4 + $0x50] sm:$0xff]  ;;  %v2063_v54 = vld [vmem:[%s3098_s4 + $0x58] sm:$0xff]  ;;  %v1775_v57 = vld [vmem:[%s3095_s1] sm:$0xff] }
  0x20   :  { %473 = vperm.xlu0 %2467, %v72_v28   ;;  %446 = vperm.xlu1 %2468, %v70_v31   ;;  %v1777_v55 = vld [vmem:[%s3095_s1 + $0x10] sm:$0xff]  ;;  %v1778_v56 = vld [vmem:[%s3095_s1 + $0x18] sm:$0xff]  ;;  %v1776_v58 = vld [vmem:[%s3095_s1 + $0x8] sm:$0xff] }
  0x21   :  { %2236 = vmatpush3.bf16.msra.mxu0 %v2487_v9  ;;  %2256 = vmatpush3.bf16.msra.mxu1 %v2490_v10  ;;  %v2504_v59 = vld [vmem:[#allocation3 + $0xf8] sm:$0xff]   ;;  %v2506_v61 = vld [vmem:[#allocation3 + $0xf0] sm:$0xff]   ;;  %v2508_v63 = vld [vmem:[#allocation3 + $0xe8] sm:$0xff]  }
  0x22   :  { %2237 = vmatprep.subr.bf16.mxu0 %v2489_v13  ;;  %2257 = vmatprep.subr.bf16.mxu1 %v2492_v15  ;;  %v2505_v60 = vld [vmem:[#allocation3 + $0x138] sm:$0xff]   ;;  %v2507_v62 = vld [vmem:[#allocation3 + $0x130] sm:$0xff]   ;;  %v2509_v0 = vld [vmem:[#allocation3 + $0x128] sm:$0xff]  }
  0x23   :  { %v2510_v1 = vld [vmem:[#allocation3 + $0xe0] sm:$0xff]   ;;  %v2512_v3 = vld [vmem:[#allocation3 + $0xd8] sm:$0xff]   ;;  %v2514_v5 = vld [vmem:[#allocation3 + $0xd0] sm:$0xff]  }
  0x24   :  { %478 = vperm.xlu0 %2467, %v73_v32   ;;  %483 = vperm.xlu1 %2468, %v74_v33   ;;  %v2511_v2 = vld [vmem:[#allocation3 + $0x120] sm:$0xff]   ;;  %v2513_v4 = vld [vmem:[#allocation3 + $0x118] sm:$0xff]   ;;  %v2515_v6 = vld [vmem:[#allocation3 + $0x110] sm:$0xff]  }
  0x25   :  { %2238 = vmatpush3.bf16.msra.mxu0 %v2489_v13  ;;  %2258 = vmatpush3.bf16.msra.mxu1 %v2492_v15  ;;  %v2516_v7 = vld [vmem:[#allocation3 + $0xc8] sm:$0xff]   ;;  %v2518_v9 = vld [vmem:[#allocation3 + $0xc0] sm:$0xff]   ;;  %v2835_v11 = vld [vmem:[#allocation3 + $0x178] sm:$0xff]   ;;  %v422_v15 = vlaneseq }
  0x26   :  { %2239 = vmatprep.subr.bf16.mxu0 %v2491_v16  ;;  %2259 = vmatprep.subr.bf16.mxu1 %v2494_v17  ;;  %v2517_v8 = vld [vmem:[#allocation3 + $0x108] sm:$0xff]   ;;  %v2519_v10 = vld [vmem:[#allocation3 + $0x100] sm:$0xff]  }
  0x27   :  { %v2839_v19 = vshrl.u32 %v422_v15, 7 }
  0x28   :  { %914 = vperm.xlu0 %2467, %v2024_v34   ;;  %919 = vperm.xlu1 %2468, %v2025_v36  }
  0x29   :  { %2240 = vmatpush3.bf16.msra.mxu0 %v2491_v16  ;;  %2260 = vmatpush3.bf16.msra.mxu1 %v2494_v17  ;;  %vm424_vm0 = vcmp.lt.s32.totalorder %v2839_v19, 1  ;;  %vm461_vm1 = vcmp.lt.s32.totalorder %v2839_v19, 7  ;;  %vm907_vm2 = vcmp.lt.s32.totalorder %v2839_v19, 2  ;;  %vm944_vm3 = vcmp.lt.s32.totalorder %v2839_v19, 6 }
  0x2a   :  { %2241 = vmatprep.subr.bf16.mxu0 %v2493_v18  ;;  %2261 = vmatprep.subr.bf16.mxu1 %v2496_v21  ;;  %vm1389_vm5 = vcmp.lt.s32.totalorder %v2839_v19, 4 }
  0x2c   :  { %924 = vperm.xlu0 %2467, %v2026_v37   ;;  %951 = vperm.xlu1 %2468, %v2028_v39  }
  0x2d   :  { %2242 = vmatpush3.bf16.msra.mxu0 %v2493_v18  ;;  %2262 = vmatpush3.bf16.msra.mxu1 %v2496_v21 }
  0x2e   :  { %2267 = vmatprep.subr.bf16.mxu0 %v2495_v25  ;;  %2287 = vmatprep.subr.bf16.mxu1 %v2504_v59 }
  0x30   :  { %2244 = vmatmul.mubr.bf16.vlgmr.msra.gmra.mxu0 %v2758_v27  ;;  %2264 = vmatmul.mubr.bf16.vlgmr.msra.gmra.mxu1 %v2758_v27 }
  0x31   :  { %2268 = vmatpush3.bf16.msra.mxu0 %v2495_v25  ;;  %2283 = vmatprep.mubr.bf16.mxu0 %v75_v14 }
  0x32   :  { %2269 = vmatprep.subr.bf16.mxu0 %v2497_v29  ;;  %956 = vperm.xlu0 %2467, %v2029_v40  }
  0x33   :  { %929 = vperm.xlu1 %2468, %v2027_v42   ;;  %2288 = vmatpush3.bf16.msra.mxu1 %v2504_v59 }
  0x34   :  { %2289 = vmatprep.subr.bf16.mxu1 %v2506_v61 }
  0x35   :  { %2270 = vmatpush3.bf16.msra.mxu0 %v2497_v29 }
  0x36   :  { %2271 = vmatprep.subr.bf16.mxu0 %v2498_v30  ;;  %961 = vperm.xlu0 %2467, %v2030_v43  }
  0x37   :  { %966 = vperm.xlu1 %2468, %v2031_v45   ;;  %2290 = vmatpush3.bf16.msra.mxu1 %v2506_v61 }
  0x38   :  { %2291 = vmatprep.subr.bf16.mxu1 %v2508_v63 }
  0x39   :  { %2272 = vmatpush3.bf16.msra.mxu0 %v2498_v30 }
  0x3a   :  { %2273 = vmatprep.subr.bf16.mxu0 %v2499_v35  ;;  %1396 = vperm.xlu0 %2467, %v2056_v46  }
  0x3b   :  { %1401 = vperm.xlu1 %2468, %v2057_v48   ;;  %2292 = vmatpush3.bf16.msra.mxu1 %v2508_v63 }
  0x3c   :  { %2293 = vmatprep.subr.bf16.mxu1 %v2510_v1 }
  0x3d   :  { %2274 = vmatpush3.bf16.msra.mxu0 %v2499_v35 }
  0x3e   :  { %2275 = vmatprep.subr.bf16.mxu0 %v2500_v38  ;;  %1406 = vperm.xlu0 %2467, %v2058_v49  }
  0x3f   :  { %1432 = vperm.xlu1 %2468, %v2060_v50   ;;  %2294 = vmatpush3.bf16.msra.mxu1 %v2510_v1 }
  0x40   :  { %2295 = vmatprep.subr.bf16.mxu1 %v2512_v3 }
  0x41   :  { %2276 = vmatpush3.bf16.msra.mxu0 %v2500_v38 }
  0x42   :  { %2277 = vmatprep.subr.bf16.mxu0 %v2501_v41  ;;  %1437 = vperm.xlu0 %2467, %v2061_v51  }
  0x43   :  { %1411 = vperm.xlu1 %2468, %v2059_v52   ;;  %2296 = vmatpush3.bf16.msra.mxu1 %v2512_v3 }
  0x44   :  { %2297 = vmatprep.subr.bf16.mxu1 %v2514_v5 }
  0x45   :  { %2278 = vmatpush3.bf16.msra.mxu0 %v2501_v41 }
  0x46   :  { %2279 = vmatprep.subr.bf16.mxu0 %v2502_v44  ;;  %1442 = vperm.xlu0 %2467, %v2062_v53  }
  0x47   :  { %1447 = vperm.xlu1 %2468, %v2063_v54   ;;  %2298 = vmatpush3.bf16.msra.mxu1 %v2514_v5 }
  0x48   :  { %2299 = vmatprep.subr.bf16.mxu1 %v2516_v7 }
  0x49   :  { %2280 = vmatpush3.bf16.msra.mxu0 %v2502_v44 }
  0x4a   :  { %2281 = vmatprep.subr.bf16.mxu0 %v2503_v47  ;;  %1801 = vperm.xlu0 %2467, %v1777_v55  }
  0x4b   :  { %1806 = vperm.xlu1 %2468, %v1778_v56   ;;  %2300 = vmatpush3.bf16.msra.mxu1 %v2516_v7 }
  0x4c   :  { %2301 = vmatprep.subr.bf16.mxu1 %v2518_v9 }
  0x4d   :  { %2282 = vmatpush3.bf16.msra.mxu0 %v2503_v47 }
  0x4e   :  { %1791 = vperm.xlu0 %2467, %v1775_v57   ;;  %2307 = vmatprep.subr.bf16.mxu0 %v2505_v60 }
  0x4f   :  { %1796 = vperm.xlu1 %2468, %v1776_v58   ;;  %2302 = vmatpush3.bf16.msra.mxu1 %v2518_v9 }
  0x50   :  { %2284 = vmatmul.mubr.bf16.vlgmr.msra.gmra.mxu0 %v2758_v27  ;;  %2327 = vmatprep.subr.bf16.mxu1 %v2835_v11 }
  0x51   :  { %2308 = vmatpush3.bf16.msra.mxu0 %v2505_v60 }
  0x52   :  { %2309 = vmatprep.subr.bf16.mxu0 %v2507_v62 }
  0x55   :  { %2310 = vmatpush3.bf16.msra.mxu0 %v2507_v62 }
  0x56   :  { %2311 = vmatprep.subr.bf16.mxu0 %v2509_v0 }
  0x59   :  { %2312 = vmatpush3.bf16.msra.mxu0 %v2509_v0 }
  0x5a   :  { %2313 = vmatprep.subr.bf16.mxu0 %v2511_v2 }
  0x5d   :  { %2314 = vmatpush3.bf16.msra.mxu0 %v2511_v2 }
  0x5e   :  { %2315 = vmatprep.subr.bf16.mxu0 %v2513_v4 }
  0x61   :  { %2316 = vmatpush3.bf16.msra.mxu0 %v2513_v4 }
  0x62   :  { %2317 = vmatprep.subr.bf16.mxu0 %v2515_v6 }
  0x65   :  { %2318 = vmatpush3.bf16.msra.mxu0 %v2515_v6 }
  0x66   :  { %2319 = vmatprep.subr.bf16.mxu0 %v2517_v8 }
  0x69   :  { %2320 = vmatpush3.bf16.msra.mxu0 %v2517_v8 }
  0x6a   :  { %2321 = vmatprep.subr.bf16.mxu0 %v2519_v10 }
  0x6d   :  { %2322 = vmatpush3.bf16.msra.mxu0 %v2519_v10 }
  0x93   :  { %v432_v14 = vpop.permute.xlu0 %431  ;;  %v442_v16 = vpop.permute.xlu1 %441 }
  0x97   :  { %v437_v18 = vpop.permute.xlu0 %436  ;;  %v469_v22 = vpop.permute.xlu1 %468 }
  0x9b   :  { %v474_v29 = vpop.permute.xlu0 %473  ;;  %v447_v33 = vpop.permute.xlu1 %446 }
  0x9f   :  { %v479_v45 = vpop.permute.xlu0 %478  ;;  %v484_v52 = vpop.permute.xlu1 %483 }
  0xf0   :  { %v2245_v12 = vpop.f32.mrf.mxu0  ;;  %v2265_v20 = vpop.f32.mrf.mxu1 }
  0xf1   :  { %v420_v27 = vrot.slane %v2245_v12, 7 }
  0xf2   :  { %v175_v13 = vpop.f32.mrf.mxu0  ;;  %v289_v26 = vpop.f32.mrf.mxu1 }
  0xf3   :  { %v418_v25 = vrot.slane %v175_v13, 7 }
  0xf4   :  { %v2246_v17 = vpop.f32.mrf.mxu0  ;;  %v2266_v34 = vpop.f32.mrf.mxu1 }
  0xf5   :  { %v421_v23 = vrot.slane %v2246_v17, 7 }
  0xf6   :  { %v178_v21 = vpop.f32.mrf.mxu0  ;;  %v292_v46 = vpop.f32.mrf.mxu1 }
  0xf7   :  { %v419_v24 = vrot.slane %v178_v21, 7  ;;  %v428_v30 = vsel %vm424_vm0, %v421_v23, %v418_v25  ;;  %v425_v37 = vsel %vm424_vm0, %v420_v27, %v421_v23 }
  0xf8   :  { %v449_v36 = vmul.f32 %v432_v14, %v428_v30  ;;  %v452_v50 = vmul.f32 %v447_v33, %v425_v37  ;;  %v524_v33 = vld [vmem:[%s3101_s7] sm:$0x1] }
  0xf9   :  { %v426_v31 = vsel %vm424_vm0, %v419_v24, %v420_v27  ;;  %v427_v35 = vsel %vm424_vm0, %v418_v25, %v419_v24  ;;  %v526_v37 = vld [vmem:[%s3102_s8] sm:$0x1] }
  0xfa   :  { %v451_v39 = vmul.f32 %v442_v16, %v426_v31  ;;  %v450_v43 = vmul.f32 %v437_v18, %v427_v35  ;;  %v453_v54 = vadd.f32 %v449_v36, %v289_v26  ;;  %v456_v61 = vadd.f32 %v2266_v34, %v452_v50 }
  0xfb   :  { %v2863_v34 = vsub.s32 0, %v2839_v19 }
  0xfc   :  { %v455_v53 = vadd.f32 %v2265_v20, %v451_v39  ;;  %v454_v57 = vadd.f32 %v450_v43, %v292_v46 }
 0x110   :  { %v2285_v28 = vpop.f32.mrf.mxu0 }
 0x111   :  { %v459_v40 = vrot.slane %v2285_v28, 1 }
 0x112   :  { %v403_v32 = vpop.f32.mrf.mxu0 }
 0x113   :  { %v457_v41 = vrot.slane %v403_v32, 1 }
 0x114   :  { %v2286_v38 = vpop.f32.mrf.mxu0 }
 0x115   :  { %v460_v42 = vrot.slane %v2286_v38, 1 }
 0x116   :  { %v406_v44 = vpop.f32.mrf.mxu0 }
 0x117   :  { %v462_v47 = vsel %vm461_vm1, %v459_v40, %v460_v42  ;;  %v465_v48 = vsel %vm461_vm1, %v460_v42, %v457_v41  ;;  %v458_v49 = vrot.slane %v406_v44, 1 }
 0x118   :  { %v488_v51 = vmul.f32 %v479_v45, %v462_v47  ;;  %v489_v58 = vmul.f32 %v484_v52, %v465_v48 }
 0x119   :  { %v463_v55 = vsel %vm461_vm1, %v458_v49, %v459_v40  ;;  %v464_v56 = vsel %vm461_vm1, %v457_v41, %v458_v49 }
 0x11a   :  { %v486_v59 = vmul.f32 %v469_v22, %v464_v56  ;;  %v487_v60 = vmul.f32 %v474_v29, %v463_v55  ;;  %v492_v62 = vadd.f32 %v488_v51, %v455_v53  ;;  %v493_v1 = vadd.f32 %v489_v58, %v456_v61  ;;  %v2521_v56 = vld [vmem:[#allocation3 + $0x170] sm:$0xff]   ;;  %v2523_v58 = vld [vmem:[#allocation3 + $0x160] sm:$0xff]   ;;  %v2526_v61 = vld [vmem:[#allocation3 + $0x148] sm:$0xff]  }
 0x11c   :  { %v490_v63 = vadd.f32 %v486_v59, %v453_v54  ;;  %v491_v0 = vadd.f32 %v487_v60, %v454_v57  ;;  %v507_v5 = vmul.f32 %v492_v62, %v492_v62  ;;  %v508_v8 = vmul.f32 %v493_v1, %v493_v1  ;;  %v2522_v57 = vld [vmem:[#allocation3 + $0x168] sm:$0xff]   ;;  %v2524_v59 = vld [vmem:[#allocation3 + $0x158] sm:$0xff]   ;;  %v2525_v60 = vld [vmem:[#allocation3 + $0x150] sm:$0xff]  }
 0x11e   :  { %v494_v2 = vadd.f32 %v491_v0, %v490_v63  ;;  %v505_v3 = vmul.f32 %v490_v63, %v490_v63  ;;  %v506_v4 = vmul.f32 %v491_v0, %v491_v0 }
 0x120   :  { %v495_v6 = vadd.f32 %v494_v2, %v492_v62  ;;  %v509_v7 = vadd.f32 %v506_v4, %v505_v3  ;;  %v2532_v2 = vld [vmem:[#allocation3 + $0x1a8] sm:$0xff]   ;;  %v2534_v4 = vld [vmem:[#allocation3 + $0x1a0] sm:$0xff]  }
 0x121   :  { %v2533_v3 = vld [vmem:[#allocation3 + $0x1e8] sm:$0xff]  }
 0x122   :  { %v496_v9 = vadd.f32 %v495_v6, %v493_v1  ;;  %v510_v10 = vadd.f32 %v509_v7, %v507_v5  ;;  %v2535_v5 = vld [vmem:[#allocation3 + $0x1e0] sm:$0xff]   ;;  %v2536_v6 = vld [vmem:[#allocation3 + $0x198] sm:$0xff]  }
 0x123   :  { %v2537_v7 = vld [vmem:[#allocation3 + $0x1d8] sm:$0xff]  }
 0x124   :  { %v497_v12 = vrot.slane %v496_v9, 4  ;;  %v511_v13 = vadd.f32 %v510_v10, %v508_v8  ;;  %v2538_v8 = vld [vmem:[#allocation3 + $0x190] sm:$0xff]   ;;  %v2540_v10 = vld [vmem:[#allocation3 + $0x188] sm:$0xff]  }
 0x126   :  { %v498_v14 = vadd.f32 %v497_v12, %v496_v9  ;;  %v512_v16 = vrot.slane %v511_v13, 4  ;;  %v2539_v9 = vld [vmem:[#allocation3 + $0x1d0] sm:$0xff]   ;;  %v2541_v12 = vld [vmem:[#allocation3 + $0x1c8] sm:$0xff]  }
 0x128   :  { %v499_v17 = vrot.slane %v498_v14, 2  ;;  %v513_v18 = vadd.f32 %v512_v16, %v511_v13  ;;  %v2542_v13 = vld [vmem:[#allocation3 + $0x180] sm:$0xff]   ;;  %v2871_v16 = vld [vmem:[#allocation3 + $0x238] sm:$0xff]  }
 0x12a   :  { %v500_v20 = vadd.f32 %v499_v17, %v498_v14  ;;  %v514_v21 = vrot.slane %v513_v18, 2  ;;  %v2543_v14 = vld [vmem:[#allocation3 + $0x1c0] sm:$0xff]  }
 0x12c   :  { %v501_v22 = vrot.slane %v500_v20, 1  ;;  %v515_v23 = vadd.f32 %v514_v21, %v513_v18  ;;  %v920_v21 = vpop.permute.xlu1 %919 }
 0x12e   :  { %v516_v24 = vrot.slane %v515_v23, 1  ;;  %v502_v25 = vadd.f32 %v501_v22, %v500_v20  ;;  %v915_v20 = vpop.permute.xlu0 %914 }
 0x130   :  { %v517_v26 = vadd.f32 %v516_v24, %v515_v23  ;;  %v504_v27 = vmul.f32 0.03125, %v502_v25  ;;  %v952_v25 = vpop.permute.xlu1 %951 }
 0x132   :  { %v518_v28 = vmul.f32 0.03125, %v517_v26  ;;  %v519_v29 = vmul.f32 %v504_v27, %v504_v27  ;;  %v925_v23 = vpop.permute.xlu0 %924 }
 0x134   :  { %v520_v30 = vsub.f32 %v518_v28, %v519_v29 }
 0x136   :  { %v521_v31 = vmax.f32 %v520_v30, 0.0 }
 0x138   :  { %v522_v32 = vadd.f32 1e-05, %v521_v31 }
 0x13a   :  { %2568 = vrsqrt.f32 %v522_v32  ;;  %v957_v32 = vpop.permute.xlu0 %956 }
 0x147   :  { %v2569_v35 = vpop.eup %2568 }
 0x148   :  { %v525_v36 = vmul.f32 %v2569_v35, %v524_v33 }
 0x14a   :  { %v527_v38 = vmul.f32 %v525_v36, %v504_v27  ;;  %v532_v39 = vrot.slane %v525_v36, %v2863_v34 }
 0x14c   :  { %v528_v40 = vsub.f32 %v526_v37, %v527_v38  ;;  %v533_v41 = vmul.f32 %v532_v39, %v490_v63  ;;  %v534_v42 = vmul.f32 %v532_v39, %v491_v0  ;;  %v535_v44 = vmul.f32 %v532_v39, %v492_v62  ;;  %v2527_v62 = vld [vmem:[#allocation3 + $0x140] sm:$0xff]   ;;  %v2529_v63 = vld [vmem:[#allocation3 + $0x1f8] sm:$0xff]   ;;  %v2530_v0 = vld [vmem:[#allocation3 + $0x1b0] sm:$0xff]   ;;  %v930_v38 = vpop.permute.xlu1 %929 }
 0x14d   :  { %v536_v45 = vmul.f32 %v532_v39, %v493_v1  ;;  %v2531_v1 = vld [vmem:[#allocation3 + $0x1f0] sm:$0xff]  }
 0x14e   :  { %v540_v43 = vrot.slane %v528_v40, %v2863_v34 }
 0x150   :  { %v541_v46 = vadd.f32 %v540_v43, %v533_v41  ;;  %v542_v47 = vadd.f32 %v540_v43, %v534_v42  ;;  %v543_v48 = vadd.f32 %v540_v43, %v535_v44  ;;  %v544_v49 = vadd.f32 %v540_v43, %v536_v45 }
 0x152   :  { %v545_v50 = vmax.f32 %v541_v46, 0.0  ;;  %v546_v51 = vmax.f32 %v542_v47, 0.0  ;;  %v547_v52 = vmax.f32 %v543_v48, 0.0  ;;  %v548_v53 = vmax.f32 %v544_v49, 0.0 }
 0x154   :  { %v559_v54 = vpack.c.bf16 %v546_v51, %v545_v50  ;;  %v560_v55 = vpack.c.bf16 %v548_v53, %v547_v52  ;;  %v962_v50 = vpop.permute.xlu0 %961 }
 0x156   :  { %2303 = vmatprep.mubr.bf16.mxu1 %v559_v54  ;;  %2323 = vmatprep.mubr.bf16.mxu0 %v559_v54 }
 0x157   :  { %2304 = vmatmul.mubr.bf16.vlgmr.msra.gmra.mxu1 %v560_v55  ;;  %2324 = vmatmul.mubr.bf16.vlgmr.msra.gmra.mxu0 %v560_v55 }
 0x158   :  { %2328 = vmatpush3.bf16.msra.mxu1 %v2835_v11  ;;  %2343 = vmatprep.mubr.bf16.mxu1 %v559_v54  ;;  %v2528_v11 = vld [vmem:[#allocation3 + $0x1b8] sm:$0xff]  }
 0x159   :  { %2329 = vmatprep.subr.bf16.mxu1 %v2521_v56  ;;  %2347 = vmatprep.subr.bf16.mxu0 %v2528_v11 }
 0x15a   :  { %2348 = vmatpush3.bf16.msra.mxu0 %v2528_v11 }
 0x15b   :  { %2349 = vmatprep.subr.bf16.mxu0 %v2530_v0 }
 0x15c   :  { %2330 = vmatpush3.bf16.msra.mxu1 %v2521_v56  ;;  %v967_v56 = vpop.permute.xlu1 %966 }
 0x15d   :  { %2331 = vmatprep.subr.bf16.mxu1 %v2522_v57 }
 0x15e   :  { %2350 = vmatpush3.bf16.msra.mxu0 %v2530_v0 }
 0x15f   :  { %2351 = vmatprep.subr.bf16.mxu0 %v2532_v2 }
 0x160   :  { %2332 = vmatpush3.bf16.msra.mxu1 %v2522_v57 }
 0x161   :  { %2333 = vmatprep.subr.bf16.mxu1 %v2523_v58 }
 0x162   :  { %2352 = vmatpush3.bf16.msra.mxu0 %v2532_v2 }
 0x163   :  { %2353 = vmatprep.subr.bf16.mxu0 %v2534_v4 }
 0x164   :  { %2334 = vmatpush3.bf16.msra.mxu1 %v2523_v58 }
 0x165   :  { %2335 = vmatprep.subr.bf16.mxu1 %v2524_v59 }
 0x166   :  { %2354 = vmatpush3.bf16.msra.mxu0 %v2534_v4 }
 0x167   :  { %2355 = vmatprep.subr.bf16.mxu0 %v2536_v6 }
 0x168   :  { %2336 = vmatpush3.bf16.msra.mxu1 %v2524_v59 }
 0x169   :  { %2337 = vmatprep.subr.bf16.mxu1 %v2525_v60 }
 0x16a   :  { %2356 = vmatpush3.bf16.msra.mxu0 %v2536_v6 }
 0x16b   :  { %2357 = vmatprep.subr.bf16.mxu0 %v2538_v8 }
 0x16c   :  { %2338 = vmatpush3.bf16.msra.mxu1 %v2525_v60 }
 0x16d   :  { %2339 = vmatprep.subr.bf16.mxu1 %v2526_v61 }
 0x16e   :  { %2358 = vmatpush3.bf16.msra.mxu0 %v2538_v8 }
 0x16f   :  { %2359 = vmatprep.subr.bf16.mxu0 %v2540_v10 }
 0x170   :  { %2340 = vmatpush3.bf16.msra.mxu1 %v2526_v61 }
 0x171   :  { %2341 = vmatprep.subr.bf16.mxu1 %v2527_v62 }
 0x172   :  { %2360 = vmatpush3.bf16.msra.mxu0 %v2540_v10 }
 0x173   :  { %2361 = vmatprep.subr.bf16.mxu0 %v2542_v13 }
 0x174   :  { %2342 = vmatpush3.bf16.msra.mxu1 %v2527_v62 }
 0x175   :  { %2367 = vmatprep.subr.bf16.mxu1 %v2529_v63 }
 0x176   :  { %2362 = vmatpush3.bf16.msra.mxu0 %v2542_v13 }
 0x177   :  { %2344 = vmatmul.mubr.bf16.vlgmr.msra.gmra.mxu1 %v560_v55  ;;  %2387 = vmatprep.subr.bf16.mxu0 %v2871_v16 }
 0x178   :  { %2368 = vmatpush3.bf16.msra.mxu1 %v2529_v63 }
 0x179   :  { %2369 = vmatprep.subr.bf16.mxu1 %v2531_v1 }
 0x17c   :  { %2370 = vmatpush3.bf16.msra.mxu1 %v2531_v1 }
 0x17d   :  { %2371 = vmatprep.subr.bf16.mxu1 %v2533_v3 }
 0x180   :  { %2372 = vmatpush3.bf16.msra.mxu1 %v2533_v3 }
 0x181   :  { %2373 = vmatprep.subr.bf16.mxu1 %v2535_v5 }
 0x184   :  { %2374 = vmatpush3.bf16.msra.mxu1 %v2535_v5 }
 0x185   :  { %2375 = vmatprep.subr.bf16.mxu1 %v2537_v7 }
 0x188   :  { %2376 = vmatpush3.bf16.msra.mxu1 %v2537_v7 }
 0x189   :  { %2377 = vmatprep.subr.bf16.mxu1 %v2539_v9 }
 0x18c   :  { %2378 = vmatpush3.bf16.msra.mxu1 %v2539_v9 }
 0x18d   :  { %2379 = vmatprep.subr.bf16.mxu1 %v2541_v12 }
 0x190   :  { %2380 = vmatpush3.bf16.msra.mxu1 %v2541_v12 }
 0x191   :  { %2381 = vmatprep.subr.bf16.mxu1 %v2543_v14 }
 0x194   :  { %2382 = vmatpush3.bf16.msra.mxu1 %v2543_v14 }
 0x217   :  { %v2305_v17 = vpop.f32.mrf.mxu1  ;;  %v2325_v26 = vpop.f32.mrf.mxu0 }
 0x218   :  { %v905_v30 = vrot.slane %v2305_v17, 6 }
 0x219   :  { %v660_v18 = vpop.f32.mrf.mxu1  ;;  %v774_v33 = vpop.f32.mrf.mxu0 }
 0x21a   :  { %v903_v29 = vrot.slane %v660_v18, 6 }
 0x21b   :  { %v2306_v22 = vpop.f32.mrf.mxu1  ;;  %v2326_v43 = vpop.f32.mrf.mxu0 }
 0x21c   :  { %v906_v27 = vrot.slane %v2306_v22, 6 }
 0x21d   :  { %v663_v24 = vpop.f32.mrf.mxu1  ;;  %v777_v59 = vpop.f32.mrf.mxu0 }
 0x21e   :  { %v904_v28 = vrot.slane %v663_v24, 6  ;;  %v911_v35 = vsel %vm907_vm2, %v906_v27, %v903_v29  ;;  %v908_v41 = vsel %vm907_vm2, %v905_v30, %v906_v27 }
 0x21f   :  { %v932_v40 = vmul.f32 %v915_v20, %v911_v35  ;;  %v935_v54 = vmul.f32 %v930_v38, %v908_v41 }
 0x220   :  { %v909_v36 = vsel %vm907_vm2, %v904_v28, %v905_v30  ;;  %v910_v39 = vsel %vm907_vm2, %v903_v29, %v904_v28 }
 0x221   :  { %v934_v44 = vmul.f32 %v925_v23, %v909_v36  ;;  %v933_v48 = vmul.f32 %v920_v21, %v910_v39  ;;  %v936_v57 = vadd.f32 %v932_v40, %v774_v33  ;;  %v939_v1 = vadd.f32 %v2326_v43, %v935_v54  ;;  %v1006_v39 = vld [vmem:[%s3101_s7 + $0x1] sm:$0x1] }
 0x223   :  { %v938_v58 = vadd.f32 %v2325_v26, %v934_v44  ;;  %v937_v62 = vadd.f32 %v933_v48, %v777_v59 }
 0x237   :  { %v2345_v31 = vpop.f32.mrf.mxu1 }
 0x238   :  { %v942_v45 = vrot.slane %v2345_v31, 2 }
 0x239   :  { %v888_v37 = vpop.f32.mrf.mxu1 }
 0x23a   :  { %v940_v46 = vrot.slane %v888_v37, 2 }
 0x23b   :  { %v2346_v42 = vpop.f32.mrf.mxu1 }
 0x23c   :  { %v943_v47 = vrot.slane %v2346_v42, 2  ;;  %v1008_v42 = vld [vmem:[%s3102_s8 + $0x1] sm:$0x1] }
 0x23d   :  { %v891_v49 = vpop.f32.mrf.mxu1 }
 0x23e   :  { %v945_v51 = vsel %vm944_vm3, %v942_v45, %v943_v47  ;;  %v948_v52 = vsel %vm944_vm3, %v943_v47, %v940_v46  ;;  %v941_v53 = vrot.slane %v891_v49, 2 }
 0x23f   :  { %v971_v55 = vmul.f32 %v962_v50, %v945_v51  ;;  %v972_v11 = vmul.f32 %v967_v56, %v948_v52 }
 0x240   :  { %v946_v60 = vsel %vm944_vm3, %v941_v53, %v942_v45  ;;  %v947_v61 = vsel %vm944_vm3, %v940_v46, %v941_v53 }
 0x241   :  { %v969_v63 = vmul.f32 %v952_v25, %v947_v61  ;;  %v970_v0 = vmul.f32 %v957_v32, %v946_v60  ;;  %v975_v2 = vadd.f32 %v971_v55, %v938_v58  ;;  %v976_v5 = vadd.f32 %v972_v11, %v939_v1  ;;  %v2545_v61 = vld [vmem:[#allocation3 + $0x230] sm:$0xff]   ;;  %v2547_v11 = vld [vmem:[#allocation3 + $0x220] sm:$0xff]   ;;  %v2550_v1 = vld [vmem:[#allocation3 + $0x208] sm:$0xff]  }
 0x243   :  { %v973_v3 = vadd.f32 %v969_v63, %v936_v57  ;;  %v974_v4 = vadd.f32 %v970_v0, %v937_v62  ;;  %v989_v9 = vmul.f32 %v975_v2, %v975_v2  ;;  %v990_v13 = vmul.f32 %v976_v5, %v976_v5  ;;  %v2546_v62 = vld [vmem:[#allocation3 + $0x228] sm:$0xff]   ;;  %v2548_v63 = vld [vmem:[#allocation3 + $0x218] sm:$0xff]   ;;  %v2549_v0 = vld [vmem:[#allocation3 + $0x210] sm:$0xff]  }
 0x245   :  { %v977_v6 = vadd.f32 %v974_v4, %v973_v3  ;;  %v987_v7 = vmul.f32 %v973_v3, %v973_v3  ;;  %v988_v8 = vmul.f32 %v974_v4, %v974_v4 }
 0x247   :  { %v978_v10 = vadd.f32 %v977_v6, %v975_v2  ;;  %v991_v12 = vadd.f32 %v988_v8, %v987_v7  ;;  %v2556_v6 = vld [vmem:[%s3103_s9 + $0x18] sm:$0xff]   ;;  %v2557_v7 = vld [vmem:[%s3103_s9 + $0x10] sm:$0xff]   ;;  %v2558_v8 = vld [vmem:[%s3103_s9 + $0x8] sm:$0xff]  }
 0x249   :  { %v979_v14 = vadd.f32 %v978_v10, %v976_v5  ;;  %v992_v17 = vadd.f32 %v991_v12, %v989_v9  ;;  %v2559_v9 = vld [vmem:[%s3103_s9] sm:$0xff]   ;;  %v2648_v10 = vmov 0.0  }
 0x24a   :  { %v2592_v12 = vld [vmem:[%s3098_s4] sm:$0xff] }
 0x24b   :  { %v980_v18 = vrot.slane %v979_v14, 4  ;;  %v993_v20 = vadd.f32 %v992_v17, %v990_v13  ;;  %1667 = vrot.lane.b32.xlu1 %v2592_v12, %s2650_s19  ;;  %v2593_v13 = vld [vmem:[%s3098_s4 + $0x8] sm:$0xff] }
 0x24d   :  { %v981_v21 = vadd.f32 %v980_v18, %v979_v14  ;;  %v994_v22 = vrot.slane %v993_v20, 4  ;;  %v2594_v14 = vld [vmem:[%s3098_s4 + $0x18] sm:$0xff] }
 0x24f   :  { %v982_v23 = vrot.slane %v981_v21, 2  ;;  %v995_v24 = vadd.f32 %v994_v22, %v993_v20  ;;  %1669 = vrot.lane.b32.xlu1 %v2593_v13, %s2650_s19  ;;  %v1397_v20 = vpop.permute.xlu0 %1396 }
 0x251   :  { %v983_v25 = vadd.f32 %v982_v23, %v981_v21  ;;  %v996_v26 = vrot.slane %v995_v24, 2  ;;  %v1402_v21 = vpop.permute.xlu1 %1401 }
 0x253   :  { %v984_v27 = vrot.slane %v983_v25, 1  ;;  %v997_v28 = vadd.f32 %v996_v26, %v995_v24  ;;  %1673 = vrot.lane.b32.xlu1 %v2594_v14, %s2650_s19  ;;  %v1407_v23 = vpop.permute.xlu0 %1406 }
 0x255   :  { %v998_v29 = vrot.slane %v997_v28, 1  ;;  %v985_v30 = vadd.f32 %v984_v27, %v983_v25  ;;  %v1433_v25 = vpop.permute.xlu1 %1432 }
 0x257   :  { %v999_v31 = vadd.f32 %v998_v29, %v997_v28  ;;  %v986_v32 = vmul.f32 0.03125, %v985_v30 }
 0x259   :  { %v1000_v33 = vmul.f32 0.03125, %v999_v31  ;;  %v1001_v35 = vmul.f32 %v986_v32, %v986_v32 }
 0x25b   :  { %v1002_v36 = vsub.f32 %v1000_v33, %v1001_v35 }
 0x25d   :  { %v1003_v37 = vmax.f32 %v1002_v36, 0.0 }
 0x25f   :  { %v1004_v38 = vadd.f32 1e-05, %v1003_v37 }
 0x261   :  { %2570 = vrsqrt.f32 %v1004_v38  ;;  %v1412_v38 = vpop.permute.xlu1 %1411 }
 0x26e   :  { %v2571_v40 = vpop.eup %2570 }
 0x26f   :  { %v1007_v41 = vmul.f32 %v2571_v40, %v1006_v39 }
 0x271   :  { %v1009_v43 = vmul.f32 %v1007_v41, %v986_v32  ;;  %v1014_v44 = vrot.slane %v1007_v41, %v2863_v34  ;;  %v1438_v32 = vpop.permute.xlu0 %1437 }
 0x273   :  { %v1010_v45 = vsub.f32 %v1008_v42, %v1009_v43  ;;  %v1015_v46 = vmul.f32 %v1014_v44, %v973_v3  ;;  %v1016_v47 = vmul.f32 %v1014_v44, %v974_v4  ;;  %v1017_v49 = vmul.f32 %v1014_v44, %v975_v2  ;;  %v2551_v2 = vld [vmem:[#allocation3 + $0x200] sm:$0xff]   ;;  %v2553_v3 = vld [vmem:[%s3103_s9 + $0x30] sm:$0xff]   ;;  %v2554_v4 = vld [vmem:[%s3103_s9 + $0x28] sm:$0xff]  }
 0x274   :  { %v1018_v50 = vmul.f32 %v1014_v44, %v976_v5  ;;  %v2555_v5 = vld [vmem:[%s3103_s9 + $0x20] sm:$0xff]  }
 0x275   :  { %v1022_v48 = vrot.slane %v1010_v45, %v2863_v34 }
 0x277   :  { %v1023_v51 = vadd.f32 %v1022_v48, %v1015_v46  ;;  %v1024_v52 = vadd.f32 %v1022_v48, %v1016_v47  ;;  %v1025_v53 = vadd.f32 %v1022_v48, %v1017_v49  ;;  %v1026_v54 = vadd.f32 %v1022_v48, %v1018_v50  ;;  %v1443_v50 = vpop.permute.xlu0 %1442 }
 0x279   :  { %v1027_v55 = vmax.f32 %v1023_v51, 0.0  ;;  %v1028_v56 = vmax.f32 %v1024_v52, 0.0  ;;  %v1029_v57 = vmax.f32 %v1025_v53, 0.0  ;;  %v1030_v58 = vmax.f32 %v1026_v54, 0.0 }
 0x27b   :  { %v1041_v59 = vpack.c.bf16 %v1028_v56, %v1027_v55  ;;  %v1042_v60 = vpack.c.bf16 %v1030_v58, %v1029_v57  ;;  %v1448_v56 = vpop.permute.xlu1 %1447 }
 0x27d   :  { %2363 = vmatprep.mubr.bf16.mxu0 %v1041_v59  ;;  %2383 = vmatprep.mubr.bf16.mxu1 %v1041_v59 }
 0x27e   :  { %2364 = vmatmul.mubr.bf16.vlgmr.msra.gmra.mxu0 %v1042_v60  ;;  %2384 = vmatmul.mubr.bf16.vlgmr.msra.gmra.mxu1 %v1042_v60 }
 0x27f   :  { %2388 = vmatpush3.bf16.msra.mxu0 %v2871_v16  ;;  %2403 = vmatprep.mubr.bf16.mxu0 %v1041_v59  ;;  %v2552_v16 = vld [vmem:[%s3103_s9 + $0x38] sm:$0xff]  }
 0x280   :  { %2389 = vmatprep.subr.bf16.mxu0 %v2545_v61  ;;  %2407 = vmatprep.subr.bf16.mxu1 %v2552_v16 }
 0x281   :  { %2408 = vmatpush3.bf16.msra.mxu1 %v2552_v16 }
 0x282   :  { %2409 = vmatprep.subr.bf16.mxu1 %v2553_v3 }
 0x283   :  { %2390 = vmatpush3.bf16.msra.mxu0 %v2545_v61 }
 0x284   :  { %2391 = vmatprep.subr.bf16.mxu0 %v2546_v62 }
 0x285   :  { %2410 = vmatpush3.bf16.msra.mxu1 %v2553_v3 }
 0x286   :  { %2411 = vmatprep.subr.bf16.mxu1 %v2554_v4 }
 0x287   :  { %2392 = vmatpush3.bf16.msra.mxu0 %v2546_v62 }
 0x288   :  { %2393 = vmatprep.subr.bf16.mxu0 %v2547_v11 }
 0x289   :  { %2412 = vmatpush3.bf16.msra.mxu1 %v2554_v4 }
 0x28a   :  { %2413 = vmatprep.subr.bf16.mxu1 %v2555_v5 }
 0x28b   :  { %2394 = vmatpush3.bf16.msra.mxu0 %v2547_v11 }
 0x28c   :  { %2395 = vmatprep.subr.bf16.mxu0 %v2548_v63 }
 0x28d   :  { %2414 = vmatpush3.bf16.msra.mxu1 %v2555_v5 }
 0x28e   :  { %2415 = vmatprep.subr.bf16.mxu1 %v2556_v6 }
 0x28f   :  { %2396 = vmatpush3.bf16.msra.mxu0 %v2548_v63 }
 0x290   :  { %2397 = vmatprep.subr.bf16.mxu0 %v2549_v0 }
 0x291   :  { %2416 = vmatpush3.bf16.msra.mxu1 %v2556_v6 }
 0x292   :  { %2417 = vmatprep.subr.bf16.mxu1 %v2557_v7 }
 0x293   :  { %2398 = vmatpush3.bf16.msra.mxu0 %v2549_v0 }
 0x294   :  { %2399 = vmatprep.subr.bf16.mxu0 %v2550_v1 }
 0x295   :  { %2418 = vmatpush3.bf16.msra.mxu1 %v2557_v7 }
 0x296   :  { %2419 = vmatprep.subr.bf16.mxu1 %v2558_v8 }
 0x297   :  { %2400 = vmatpush3.bf16.msra.mxu0 %v2550_v1 }
 0x298   :  { %2401 = vmatprep.subr.bf16.mxu0 %v2551_v2 }
 0x299   :  { %2420 = vmatpush3.bf16.msra.mxu1 %v2558_v8 }
 0x29a   :  { %2421 = vmatprep.subr.bf16.mxu1 %v2559_v9 }
 0x29b   :  { %2402 = vmatpush3.bf16.msra.mxu0 %v2551_v2 }
 0x29c   :  { %2427 = vmatprep.subr.bf16.mxu0 %v2648_v10 }
 0x29d   :  { %2422 = vmatpush3.bf16.msra.mxu1 %v2559_v9 }
 0x29e   :  { %2404 = vmatmul.mubr.bf16.vlgmr.msra.gmra.mxu0 %v1042_v60  ;;  %2435 = vmatprep.subr.bf16.mxu1 %v2648_v10 }
 0x29f   :  { %2431 = vmatprep.mubr.msk.bf16.mxu0 %vm2649_vm4, %v2648_v10 }
 0x33e   :  { %v2365_v17 = vpop.f32.mrf.mxu0  ;;  %v2385_v26 = vpop.f32.mrf.mxu1 }
 0x33f   :  { %v1387_v30 = vrot.slane %v2365_v17, 4 }
 0x340   :  { %v1142_v18 = vpop.f32.mrf.mxu0  ;;  %v1256_v33 = vpop.f32.mrf.mxu1 }
 0x341   :  { %v1385_v29 = vrot.slane %v1142_v18, 4 }
 0x342   :  { %v2366_v22 = vpop.f32.mrf.mxu0  ;;  %v2386_v43 = vpop.f32.mrf.mxu1 }
 0x343   :  { %v1388_v27 = vrot.slane %v2366_v22, 4 }
 0x344   :  { %v1145_v24 = vpop.f32.mrf.mxu0  ;;  %v1259_v59 = vpop.f32.mrf.mxu1 }
 0x345   :  { %v1386_v28 = vrot.slane %v1145_v24, 4  ;;  %v1393_v35 = vsel %vm1389_vm5, %v1388_v27, %v1385_v29  ;;  %v1390_v41 = vsel %vm1389_vm5, %v1387_v30, %v1388_v27 }
 0x346   :  { %v1414_v40 = vmul.f32 %v1397_v20, %v1393_v35  ;;  %v1417_v54 = vmul.f32 %v1412_v38, %v1390_v41 }
 0x347   :  { %v1391_v36 = vsel %vm1389_vm5, %v1386_v28, %v1387_v30  ;;  %v1392_v39 = vsel %vm1389_vm5, %v1385_v29, %v1386_v28 }
 0x348   :  { %v1416_v44 = vmul.f32 %v1407_v23, %v1391_v36  ;;  %v1415_v48 = vmul.f32 %v1402_v21, %v1392_v39  ;;  %v1418_v57 = vadd.f32 %v1414_v40, %v1256_v33  ;;  %v1421_v1 = vadd.f32 %v2386_v43, %v1417_v54  ;;  %v1487_v39 = vld [vmem:[%s3101_s7 + $0x2] sm:$0x1] }
 0x349   :  { %v1781_v43 = vand.u32 127, %v422_v15 }
 0x34a   :  { %v1420_v58 = vadd.f32 %v2385_v26, %v1416_v44  ;;  %v1419_v62 = vadd.f32 %v1415_v48, %v1259_v59 }
 0x34b   :  { %vm1782_vm6 = vcmp.ge.s32.totalorder %v1781_v43, 32 }
 0x35e   :  { %v2405_v31 = vpop.f32.mrf.mxu0 }
 0x35f   :  { %v1424_v45 = vrot.slane %v2405_v31, 4 }
 0x360   :  { %v1370_v37 = vpop.f32.mrf.mxu0 }
 0x361   :  { %v1422_v46 = vrot.slane %v1370_v37, 4 }
 0x362   :  { %v2406_v42 = vpop.f32.mrf.mxu0 }
 0x363   :  { %v1425_v47 = vrot.slane %v2406_v42, 4  ;;  %v1489_v42 = vld [vmem:[%s3102_s8 + $0x2] sm:$0x1] }
 0x364   :  { %v1373_v49 = vpop.f32.mrf.mxu0 }
 0x365   :  { %v1426_v51 = vsel %vm1389_vm5, %v1424_v45, %v1425_v47  ;;  %v1429_v52 = vsel %vm1389_vm5, %v1425_v47, %v1422_v46  ;;  %v1423_v53 = vrot.slane %v1373_v49, 4 }
 0x366   :  { %v1452_v55 = vmul.f32 %v1443_v50, %v1426_v51  ;;  %v1453_v11 = vmul.f32 %v1448_v56, %v1429_v52  ;;  %v2104_v56 = vsel %vm1782_vm6, 1.0, %v2648_v10 }
 0x367   :  { %v1427_v60 = vsel %vm1389_vm5, %v1423_v53, %v1424_v45  ;;  %v1428_v61 = vsel %vm1389_vm5, %v1422_v46, %v1423_v53 }
 0x368   :  { %v1450_v63 = vmul.f32 %v1433_v25, %v1428_v61  ;;  %v1451_v0 = vmul.f32 %v1438_v32, %v1427_v60  ;;  %v1456_v2 = vadd.f32 %v1452_v55, %v1420_v58  ;;  %v1457_v4 = vadd.f32 %v1453_v11, %v1421_v1  ;;  %v1807_v58 = vpop.permute.xlu1 %1806 }
 0x36a   :  { %v1454_v16 = vadd.f32 %v1450_v63, %v1418_v57  ;;  %v1455_v3 = vadd.f32 %v1451_v0, %v1419_v62  ;;  %v1470_v8 = vmul.f32 %v1456_v2, %v1456_v2  ;;  %v1471_v13 = vmul.f32 %v1457_v4, %v1457_v4  ;;  %v1802_v57 = vpop.permute.xlu0 %1801 }
 0x36c   :  { %v1458_v5 = vadd.f32 %v1455_v3, %v1454_v16  ;;  %v1468_v6 = vmul.f32 %v1454_v16, %v1454_v16  ;;  %v1469_v7 = vmul.f32 %v1455_v3, %v1455_v3 }
 0x36e   :  { %v1459_v9 = vadd.f32 %v1458_v5, %v1456_v2  ;;  %v1472_v12 = vadd.f32 %v1469_v7, %v1468_v6 }
 0x370   :  { %v1460_v14 = vadd.f32 %v1459_v9, %v1457_v4  ;;  %v1473_v17 = vadd.f32 %v1472_v12, %v1470_v8  ;;  %v1779_v9 = vld [vmem:[%s3099_s5] sm:$0x1]  ;;  %v2651_v12 = vmov 127  }
 0x371   :  { %2469 = vset.pattern.permute.xlu0 %v2651_v12  ;;  %v2599_v12 = vld [vmem:[%s3097_s3] sm:$0xff] }
 0x372   :  { %v1461_v18 = vrot.slane %v1460_v14, 4  ;;  %v1474_v20 = vadd.f32 %v1473_v17, %v1471_v13  ;;  %v2560_v13 = vld [vmem:[%s3105_s11 + $0x38] sm:$0xff]  }
 0x374   :  { %v1462_v21 = vadd.f32 %v1461_v18, %v1460_v14  ;;  %v1475_v22 = vrot.slane %v1474_v20, 4  ;;  %v2561_v14 = vld [vmem:[%s3105_s11 + $0x30] sm:$0xff]   ;;  %v2562_v18 = vld [vmem:[%s3105_s11 + $0x28] sm:$0xff]  }
 0x376   :  { %v1463_v23 = vrot.slane %v1462_v21, 2  ;;  %v1476_v24 = vadd.f32 %v1475_v22, %v1474_v20 }
 0x378   :  { %v1464_v25 = vadd.f32 %v1463_v23, %v1462_v21  ;;  %v1477_v26 = vrot.slane %v1476_v24, 2 }
 0x37a   :  { %v1465_v27 = vrot.slane %v1464_v25, 1  ;;  %v1478_v28 = vadd.f32 %v1477_v26, %v1476_v24  ;;  %v2563_v26 = vld [vmem:[%s3105_s11 + $0x20] sm:$0xff]  }
 0x37c   :  { %v1479_v29 = vrot.slane %v1478_v28, 1  ;;  %v1466_v30 = vadd.f32 %v1465_v27, %v1464_v25 }
 0x37e   :  { %v1480_v31 = vadd.f32 %v1479_v29, %v1478_v28  ;;  %v1467_v32 = vmul.f32 0.03125, %v1466_v30 }
 0x380   :  { %v1481_v33 = vmul.f32 0.03125, %v1480_v31  ;;  %v1482_v35 = vmul.f32 %v1467_v32, %v1467_v32 }
 0x382   :  { %v1483_v36 = vsub.f32 %v1481_v33, %v1482_v35 }
 0x384   :  { %v1484_v37 = vmax.f32 %v1483_v36, 0.0 }
 0x386   :  { %v1485_v38 = vadd.f32 1e-05, %v1484_v37  ;;  %v2564_v37 = vld [vmem:[%s3105_s11 + $0x18] sm:$0xff]  }
 0x388   :  { %2572 = vrsqrt.f32 %v1485_v38 }
 0x395   :  { %v2573_v40 = vpop.eup %2572 }
 0x396   :  { %v1488_v41 = vmul.f32 %v2573_v40, %v1487_v39 }
 0x398   :  { %v1490_v44 = vmul.f32 %v1488_v41, %v1467_v32  ;;  %v1495_v45 = vrot.slane %v1488_v41, %v2863_v34 }
 0x39a   :  { %v1491_v46 = vsub.f32 %v1489_v42, %v1490_v44  ;;  %v1496_v47 = vmul.f32 %v1495_v45, %v1454_v16  ;;  %v1497_v48 = vmul.f32 %v1495_v45, %v1455_v3  ;;  %v1498_v50 = vmul.f32 %v1495_v45, %v1456_v2  ;;  %v1792_v3 = vpop.permute.xlu0 %1791  ;;  %v2565_v44 = vld [vmem:[%s3105_s11 + $0x10] sm:$0xff]  }
 0x39b   :  { %v1499_v51 = vmul.f32 %v1495_v45, %v1457_v4  ;;  %v1797_v4 = vpop.permute.xlu1 %1796 }
 0x39c   :  { %v1503_v49 = vrot.slane %v1491_v46, %v2863_v34 }
 0x39e   :  { %v1504_v52 = vadd.f32 %v1503_v49, %v1496_v47  ;;  %v1505_v53 = vadd.f32 %v1503_v49, %v1497_v48  ;;  %v1506_v54 = vadd.f32 %v1503_v49, %v1498_v50  ;;  %v1507_v55 = vadd.f32 %v1503_v49, %v1499_v51  ;;  %v2566_v50 = vld [vmem:[%s3105_s11 + $0x8] sm:$0xff]   ;;  %v2567_v51 = vld [vmem:[%s3105_s11] sm:$0xff]  }
 0x39f   :  { %v1668_v20 = vpop.permute.xlu1 %1667 }
 0x3a0   :  { %v1508_v15 = vmax.f32 %v1504_v52, 0.0  ;;  %v1509_v59 = vmax.f32 %v1505_v53, 0.0  ;;  %v1510_v60 = vmax.f32 %v1506_v54, 0.0  ;;  %v1511_v61 = vmax.f32 %v1507_v55, 0.0  ;;  %v2595_v53 = vld [vmem:[%s3098_s4 + $0x10] sm:$0xff] }
 0x3a2   :  { %v1512_v62 = vpack.c.bf16 %v1509_v59, %v1508_v15  ;;  %v1513_v11 = vpack.c.bf16 %v1511_v61, %v1510_v60  ;;  %v1785_v63 = vadd.f32 %v2104_v56, %v1508_v15  ;;  %v1786_v0 = vadd.f32 %v2104_v56, %v1509_v59 }
 0x3a3   :  { %v1787_v1 = vadd.f32 %v2104_v56, %v1510_v60  ;;  %v1788_v34 = vadd.f32 %v2104_v56, %v1511_v61  ;;  %v1670_v33 = vpop.permute.xlu1 %1669  ;;  %v2597_v61 = vld [vmem:[%s3097_s3 + $0x8] sm:$0xff] }
 0x3a4   :  { %2423 = vmatprep.mubr.bf16.mxu1 %v1512_v62  ;;  %v1809_v6 = vmul.f32 %v1792_v3, %v1785_v63  ;;  %v1810_v7 = vmul.f32 %v1797_v4, %v1786_v0 }
 0x3a5   :  { %2424 = vmatmul.mubr.bf16.vlgmr.msra.gmra.mxu1 %v1513_v11  ;;  %v1811_v2 = vmul.f32 %v1802_v57, %v1787_v1  ;;  %v1812_v16 = vmul.f32 %v1807_v58, %v1788_v34  ;;  %v2596_v57 = vld [vmem:[%s3097_s3 + $0x18] sm:$0xff] }
 0x3a6   :  { %2451 = vmatprep.mubr.msk.bf16.mxu1 %vm2649_vm4, %v2648_v10  ;;  %v1813_v8 = vpack.c.bf16 %v1810_v7, %v1809_v6  ;;  %2436 = vmatpush3.bf16.msra.mxu1 %v2560_v13  ;;  %v2598_v7 = vld [vmem:[%s3097_s3 + $0x10] sm:$0xff] }
 0x3a7   :  { %v1814_v5 = vpack.c.bf16 %v1812_v16, %v1811_v2  ;;  %2437 = vmatprep.subr.bf16.mxu1 %v2648_v10  ;;  %v1674_v45 = vpop.permute.xlu1 %1673  ;;  %v1704_v16 = vstv %s3104_s10 }
 0x3a9   :  { %2428 = vmatpush3.bf16.msra.mxu0 %v1814_v5 }
 0x3aa   :  { %2429 = vmatprep.subr.bf16.mxu0 %v2648_v10  ;;  %2438 = vmatpush3.bf16.msra.mxu1 %v2561_v14 }
 0x3ab   :  { %2439 = vmatprep.subr.bf16.mxu1 %v2648_v10 }
 0x3ad   :  { %2430 = vmatpush3.bf16.msra.mxu0 %v1813_v8 }
 0x3ae   :  { %2440 = vmatpush3.bf16.msra.mxu1 %v2562_v18 }
 0x3af   :  { %2441 = vmatprep.subr.bf16.mxu1 %v2648_v10 }
 0x3b0   :  { %2432 = vmatmul.mubr.msk.bf16.vlgmr.msra.gmra.mxu0 %vm1815_vm7, %v1779_v9 }
 0x3b2   :  { %2442 = vmatpush3.bf16.msra.mxu1 %v2563_v26 }
 0x3b3   :  { %2443 = vmatprep.subr.bf16.mxu1 %v2648_v10 }
 0x3b6   :  { %2444 = vmatpush3.bf16.msra.mxu1 %v2564_v37 }
 0x3b7   :  { %2445 = vmatprep.subr.bf16.mxu1 %v2648_v10 }
 0x3ba   :  { %2446 = vmatpush3.bf16.msra.mxu1 %v2565_v44 }
 0x3bb   :  { %2447 = vmatprep.subr.bf16.mxu1 %v2648_v10 }
 0x3be   :  { %2448 = vmatpush3.bf16.msra.mxu1 %v2566_v50 }
 0x3bf   :  { %2449 = vmatprep.subr.bf16.mxu1 %v2648_v10 }
 0x3c2   :  { %2450 = vmatpush3.bf16.msra.mxu1 %v2567_v51 }
 0x465   :  { %v2425_v17 = vpop.f32.mrf.mxu1 }
 0x466   :  { %v1629_v23 = vrot.slane %v2425_v17, 7  ;;  %v1661_v27 = vrot.slane %v2425_v17, 1 }
 0x467   :  { %v2977_v21 = vpop.f32.mrf.mxu1 }
 0x468   :  { %v1627_v28 = vrot.slane %v2977_v21, 7  ;;  %v1659_v41 = vrot.slane %v2977_v21, 1 }
 0x469   :  { %v2426_v22 = vpop.f32.mrf.mxu1 }
 0x46a   :  { %v1630_v24 = vrot.slane %v2426_v22, 7  ;;  %v1662_v25 = vrot.slane %v2426_v22, 1 }
 0x46b   :  { %v1615_v29 = vpop.f32.mrf.mxu1 }
 0x46c   :  { %v1628_v30 = vrot.slane %v1615_v29, 7  ;;  %v1660_v31 = vrot.slane %v1615_v29, 1  ;;  %1645 = vrot.lane.b32.xlu1 %v1615_v29, %s2652_s15  ;;  %v1631_v32 = vsel %vm424_vm0, %v1629_v23, %v1630_v24  ;;  %v1663_v35 = vsel %vm461_vm1, %v1661_v27, %v1662_v25  ;;  %v1733_v29 = vld [vmem:[%s3096_s2] sm:$0xff] }
 0x46d   :  { %v2992_v36 = vsel %vm424_vm0, %v1630_v24, %v1627_v28  ;;  %v1666_v46 = vsel %vm461_vm1, %v1662_v25, %v1659_v41  ;;  %v1638_v58 = vmul.f32 %v2596_v57, %v1631_v32 }
 0x46e   :  { %v1664_v38 = vsel %vm461_vm1, %v1660_v31, %v1661_v27  ;;  %v1632_v39 = vsel %vm424_vm0, %v1628_v30, %v1629_v23  ;;  %v1682_v48 = vmul.f32 %v1674_v45, %v1666_v46  ;;  %v1665_v54 = vsel %vm461_vm1, %v1659_v41, %v1660_v31 }
 0x46f   :  { %v1680_v43 = vmul.f32 %v1670_v33, %v1664_v38  ;;  %v1679_v55 = vmul.f32 %v1668_v20, %v1665_v54  ;;  %v1633_v60 = vsel %vm424_vm0, %v1627_v28, %v1628_v30  ;;  %v1637_v8 = vmul.f32 %v2598_v7, %v1632_v39  ;;  %v1734_v28 = vld [vmem:[%s3096_s2 + $0x8] sm:$0xff] }
 0x470   :  { %v1853_v40 = vpop.f32.mrf.mxu0  ;;  %1649 = vrot.lane.b32.xlu1 %v2426_v22, %s2652_s15  ;;  %v1636_v62 = vmul.f32 %v2597_v61, %v1633_v60  ;;  %v1635_v13 = vmul.f32 %v2599_v12, %v2992_v36 }
 0x471   :  { %2574 = vrcp.f32 %v1853_v40 }
 0x472   :  { %v2433_v42 = vpop.f32.mrf.mxu0 }
 0x474   :  { %v1856_v47 = vpop.f32.mrf.mxu0  ;;  %1689 = vrot.lane.b32.xlu1 %v1680_v43, %s2653_s0 }
 0x476   :  { %v2434_v49 = vpop.f32.mrf.mxu0 }
 0x477   :  { %v1735_v49 = vld [vmem:[%s3096_s2 + $0x10] sm:$0xff] }
 0x478   :  { %1693 = vrot.lane.b32.xlu1 %v1682_v48, %s2653_s0  ;;  %v1736_v48 = vld [vmem:[%s3096_s2 + $0x18] sm:$0xff] }
 0x47e   :  { %v2575_v52 = vpop.eup %2574 }
 0x47f   :  { %1863 = vperm.xlu0 %2469, %v2575_v52  }
 0x483   :  { %1671 = vrot.lane.b32.xlu0 %v2595_v53, %s2650_s19 }
 0x487   :  { %1643 = vrot.lane.b32.xlu0 %v2977_v21, %s2652_s15 }
 0x48b   :  { %1647 = vrot.lane.b32.xlu0 %v2425_v17, %s2652_s15 }
 0x48f   :  { %1687 = vrot.lane.b32.xlu0 %v1679_v55, %s2653_s0 }
 0x4de   :  { %v1646_v56 = vpop.permute.xlu1 %1645 }
 0x4df   :  { %v1656_v0 = vadd.f32 %v1646_v56, %v1636_v62 }
 0x4e2   :  { %v1650_v15 = vpop.permute.xlu1 %1649 }
 0x4e3   :  { %v1658_v59 = vadd.f32 %v1650_v15, %v1638_v58 }
 0x4e6   :  { %v1690_v11 = vpop.permute.xlu1 %1689 }
 0x4e7   :  { %v1700_v34 = vadd.f32 %v1690_v11, %v1656_v0 }
 0x4e9   :  { %v3040_v19 = vadd.f32 %v1704_v16, %v1700_v34 }
 0x4eb   :  { %v2097_v6 = vmul.f32 -1.442695, %v3040_v19 }
 0x4ed   :  { %2576 = vpow2.f32 %v2097_v6 }
 0x4fa   :  { %v1864_v63 = vpop.permute.xlu0 %1863  ;;  %v2577_v23 = vpop.eup %2576 }
 0x4fb   :  { %v1866_v1 = vmul.f32 %v1864_v63, %v1853_v40  ;;  %v1722_v24 = vadd.f32 1.0, %v2577_v23 }
 0x4fd   :  { %v1867_v2 = vpack.c.bf16 %v1866_v1, %v1866_v1 }
 0x4fe   :  { %v1672_v3 = vpop.permute.xlu0 %1671 }
 0x4ff   :  { %v1681_v4 = vmul.f32 %v1672_v3, %v1663_v35  ;;  %2452 = vmatmul.mubr.bf16.vlgmr.msra.gmra.mxu1 %v1867_v2  ;;  %v1694_v35 = vpop.permute.xlu1 %1693 }
 0x500   :  { %v1702_v36 = vadd.f32 %v1694_v35, %v1658_v59 }
 0x501   :  { %1691 = vrot.lane.b32.xlu0 %v1681_v4, %s2653_s0 }
 0x502   :  { %v1644_v5 = vpop.permute.xlu0 %1643  ;;  %v1708_v37 = vadd.f32 %v1704_v16, %v1702_v36 }
 0x503   :  { %v1655_v17 = vadd.f32 %v1644_v5, %v1635_v13 }
 0x504   :  { %v2099_v38 = vmul.f32 -1.442695, %v1708_v37 }
 0x506   :  { %v1648_v9 = vpop.permute.xlu0 %1647 }
 0x507   :  { %v1657_v14 = vadd.f32 %v1648_v9, %v1637_v8 }
 0x50a   :  { %v1688_v18 = vpop.permute.xlu0 %1687 }
 0x50b   :  { %v1699_v20 = vadd.f32 %v1688_v18, %v1655_v17 }
 0x50d   :  { %v1705_v21 = vadd.f32 %v1704_v16, %v1699_v20 }
 0x50f   :  { %v2096_v22 = vmul.f32 -1.442695, %v1705_v21 }
 0x511   :  { %2578 = vpow2.f32 %v2096_v22 }
 0x512   :  { %2580 = vrcp.f32 %v1722_v24 }
 0x51e   :  { %v2579_v25 = vpop.eup %2578 }
 0x51f   :  { %v1721_v26 = vadd.f32 1.0, %v2579_v25  ;;  %v2581_v27 = vpop.eup %2580 }
 0x520   :  { %vm1738_vm8 = vcmp.gt.f32.partialorder %v2581_v27, %v1734_v28 }
 0x521   :  { %2582 = vrcp.f32 %v1721_v26  ;;  %v2101_v32 = vsel %vm1738_vm8, 1.0, %v2648_v10 }
 0x522   :  { %2584 = vpow2.f32 %v2099_v38 }
 0x52e   :  { %v2583_v30 = vpop.eup %2582 }
 0x52f   :  { %vm1737_vm9 = vcmp.gt.f32.partialorder %v2583_v30, %v1733_v29  ;;  %v2585_v43 = vpop.eup %2584 }
 0x530   :  { %v2100_v31 = vsel %vm1737_vm9, 1.0, %v2648_v10  ;;  %v1724_v44 = vadd.f32 1.0, %v2585_v43 }
 0x531   :  { %v2470_v33 = vpack.i.bf16 %v2101_v32, %v2100_v31 }
 0x533   :  { %2471 = vrot.lane.b32.xlu0 %v2470_v33, %s2654_s30 }
 0x573   :  { %v1692_v39 = vpop.permute.xlu0 %1691 }
 0x574   :  { %v1701_v40 = vadd.f32 %v1692_v39, %v1657_v14 }
 0x576   :  { %v1707_v41 = vadd.f32 %v1704_v16, %v1701_v40 }
 0x578   :  { %v2098_v42 = vmul.f32 -1.442695, %v1707_v41 }
 0x57a   :  { %2586 = vpow2.f32 %v2098_v42 }
 0x57b   :  { %2588 = vrcp.f32 %v1724_v44 }
 0x587   :  { %v2587_v45 = vpop.eup %2586 }
 0x588   :  { %v1723_v46 = vadd.f32 1.0, %v2587_v45  ;;  %v2589_v47 = vpop.eup %2588 }
 0x589   :  { %vm1740_vm10 = vcmp.gt.f32.partialorder %v2589_v47, %v1736_v48 }
 0x58a   :  { %2590 = vrcp.f32 %v1723_v46  ;;  %v2103_v52 = vsel %vm1740_vm10, 1.0, %v2648_v10 }
 0x597   :  { %v2591_v50 = vpop.eup %2590 }
 0x598   :  { %vm1739_vm11 = vcmp.gt.f32.partialorder %v2591_v50, %v1735_v49 }
 0x599   :  { %v2102_v51 = vsel %vm1739_vm11, 1.0, %v2648_v10  ;;  %v2106_v10 = vld [vmem:[%s3106_s12] ss:$0 sm:$0xff] }
 0x59a   :  { %v2475_v53 = vpack.i.bf16 %v2103_v52, %v2102_v51 }
 0x59c   :  { %2476 = vrot.lane.b32.xlu1 %v2475_v53, %s2654_s30 }
 0x5a5   :  { %v2472_v54 = vpop.permute.xlu0 %2471 }
 0x5a6   :  { %v2474_v55 = vunpack.i.h.bf16 %v2472_v54  ;;  %v2473_v56 = vunpack.i.l.bf16 %v2472_v54 }
 0x5a8   :  { %v1767_v57 = vsel %vm1765_vm12, %v3040_v19, %v2474_v55  ;;  %v1766_v58 = vsel %vm1765_vm12, %v1705_v21, %v2473_v56 }
 0x5a9   :  { %1772 = vst.msk [vmem:[%s3107_s13 + $0x8] sm:$0xff] %vm1770_vm13, %v1767_v57  ;;  %1771 = vst.msk [vmem:[%s3107_s13] sm:$0xff] %vm1770_vm13, %v1766_v58 }
 0x5bf   :  { %v1973_v15 = vpop.f32.mrf.mxu1 }
 0x5c0   :  { %v1974_v59 = vadd.f32 %v2106_v10, %v1973_v15 }
 0x5c1   :  { %v2453_v60 = vpop.f32.mrf.mxu1 }
 0x5c2   :  { %v1979_v61 = vmax.f32 %v1974_v59, 0.0 }
 0x5c3   :  { %v1976_v62 = vpop.f32.mrf.mxu1 }
 0x5c4   :  { %1980 = vst [vmem:[#allocation6] sm:$0x3] %v1979_v61 }
 0x5c5   :  { %v2454_v11 = vpop.f32.mrf.mxu1 }
 0x5c6   :  { %2631 = shalt.err (!%p2628_p9)
}
 0x5c7   :  { %1992 = dma.vmem_to_hbm [thread:$0]  %s1990_s23, 32, %s3108_s14, [#allocation5]  }
 0x60e   :  { %v2477_v63 = vpop.permute.xlu1 %2476 }
 0x60f   :  { %v2479_v0 = vunpack.i.h.bf16 %v2477_v63  ;;  %v2478_v1 = vunpack.i.l.bf16 %v2477_v63 }
 0x611   :  { %v1769_v34 = vsel %vm1765_vm12, %v1708_v37, %v2479_v0  ;;  %v1768_v2 = vsel %vm1765_vm12, %v1707_v41, %v2478_v1 }
 0x612   :  { %1774 = vst.msk [vmem:[%s3107_s13 + $0x18] sm:$0xff] %vm1770_vm13, %v1769_v34  ;;  %1773 = vst.msk [vmem:[%s3107_s13 + $0x10] sm:$0xff] %vm1770_vm13, %v1768_v2 }
 0x613   :  { %2642 = dma.done.wait [#allocation5], 32  }
 0x614   :  { %2643 = vsyncadd [#allocation5], 4294967264 }
 0x615   :  { %1998 = vsyncpa [#allocation4], 1 }
 0x616   :  { %1999 = vsyncpa [#allocation5], 1 }

</bundles_post_ra>
